<compile_context>
chip_gen: v5e
topology: v5e:2x2
jax: 0.10.0
libtpu: 0.0.40
codegen_flags: <defaults>
</compile_context>

<pallas_src>
import functools

import jax
import jax.numpy as jnp
from jax.experimental import pallas as pl
from jax.experimental.pallas import tpu as pltpu

LN_EPS = 1e-5
BN_EPS = 1e-5
OUT_LANES = 128   # lane-dense output width (value broadcast; column 0 is real)


def _critic_kernel(n_layers, hidden_dim, num_nodes, b_tile,
                   x_ref, a_ref, convw_ref, convv_ref, lin1w_ref, head_ref,
                   out_ref):
    H = hidden_dim
    BN = b_tile * num_nodes
    P = x_ref.shape[2]                        # padded per-layer input width

    x = x_ref[...].reshape(BN, P)             # b_tile graphs stacked on node axis
    A = a_ref[...]                            # (BN, BN) block-diagonal adjacency

    head = head_ref[...]                      # (3, 2H) packed head parameters
    lin1_b = head[0:1, :]                     # lin1 bias with eval-BN folded in
    w2 = head[1:2, :]                         # lin2 weight pre-scaled by 1/num_nodes
    b2 = head[2:3, 0:1]                       # lin2 bias (scalar)

    # Jumping-knowledge lin1 applied segment-by-segment (no concat inside the
    # kernel); segment l lives at sublane-aligned rows [l*P, (l+1)*P).
    y = jnp.dot(x, lin1w_ref[0:P, :], preferred_element_type=jnp.float32) + lin1_b

    h = x
    for l in range(n_layers):
        cv = convv_ref[l]                     # (3, H): bias, ln_gamma, ln_beta
        # GINConv with eps = -1: pure neighbour-sum aggregation over all
        # b_tile graphs in one matmul (block-diagonal A).
        agg = jnp.dot(A, h, preferred_element_type=jnp.float32)             # (BN, P)
        # TODO(synk): on v6e/v7x the MXU operands could be cast to bf16 for
        # more throughput; kept f32 to match the f32 reference tightly.
        z = jnp.dot(agg, convw_ref[l], preferred_element_type=jnp.float32)  # (BN, H)
        z = z + cv[0:1, :]
        mu = jnp.mean(z, axis=-1, keepdims=True)
        var = jnp.mean((z - mu) ** 2, axis=-1, keepdims=True)
        z = (z - mu) * jax.lax.rsqrt(var + LN_EPS)
        z = z * cv[1:2, :] + cv[2:3, :]
        hl = jnp.maximum(z, 0.0)              # ReLU in mlp; outer .relu() is a no-op
        y = y + jnp.dot(hl, lin1w_ref[(l + 1) * P:(l + 2) * P, :],
                        preferred_element_type=jnp.float32)
        if P > H:                             # static branch (input_dim > hidden_dim)
            hl = jnp.concatenate(
                [hl, jnp.zeros((BN, P - H), jnp.float32)], axis=-1)
        h = hl

    # BatchNorm1d (eval) already folded into lin1; dropout (eval) = identity.
    # TODO(synk): training-mode dropout RNG / batch-statistics BN not implemented.
    y = jnp.maximum(y, 0.0)                                                 # (BN, 2H)

    # lin2 folded through global_mean_pool (both linear): sum-pool first,
    # then dot with (lin2_W / num_nodes).
    ysum = jnp.sum(y.reshape(b_tile, num_nodes, 2 * H), axis=1)             # (b_tile, 2H)
    pooled = jnp.sum(ysum * w2, axis=-1, keepdims=True) + b2                # (b_tile, 1)

    # Lane-dense store: broadcast the per-graph scalar across 128 lanes.
    out_ref[...] = jnp.broadcast_to(pooled[None], (1, b_tile, OUT_LANES))


def nagnn_critic_forward(obs, dist_matrix, params, *, gridsize, input_dim,
                         hidden_dim, n_layers, b_tile=4):
    num_nodes = gridsize * gridsize
    H = hidden_dim
    P = max(input_dim, hidden_dim)            # uniform padded segment width

    x = obs.reshape(-1, num_nodes, input_dim).astype(jnp.float32)
    batch = x.shape[0]

    b_tile = max(1, min(b_tile, batch))
    num_tiles = pl.cdiv(batch, b_tile)
    pad_b = num_tiles * b_tile - batch

    if P > input_dim:                         # pad feature dim (zero columns)
        x = jnp.pad(x, ((0, 0), (0, 0), (0, P - input_dim)))
    if pad_b:                                 # pad batch to a multiple of b_tile
        x = jnp.pad(x, ((0, pad_b), (0, 0), (0, 0)))

    # Shared binary adjacency; block-diagonal copy for b_tile stacked graphs.
    A = (dist_matrix == 1).astype(jnp.float32)
    A_blk = jnp.kron(jnp.eye(b_tile, dtype=jnp.float32), A)   # (b_tile*N, b_tile*N)

    # ---- pack parameters into a few dense buffers (fewer DMA descriptors) ----
    convw = jnp.stack([
        jnp.pad(params[f"conv{l}_W"],
                ((0, P - params[f"conv{l}_W"].shape[0]), (0, 0)))
        for l in range(n_layers)])                                  # (L, P, H)
    convv = jnp.stack([
        jnp.stack([params[f"conv{l}_b"].reshape(H),
                   params[f"conv{l}_ln_g"].reshape(H),
                   params[f"conv{l}_ln_b"].reshape(H)], axis=0)
        for l in range(n_layers)])                                  # (L, 3, H)

    # Fold eval-mode BatchNorm (affine, directly after lin1) into lin1.
    bn_scale = params["bn_scale"].reshape(1, 2 * H)
    bn_shift = params["bn_shift"].reshape(1, 2 * H)
    lin1_W_f = params["lin1_W"] * bn_scale                          # (mid_dim, 2H)
    lin1_b_f = (params["lin1_b"].reshape(2 * H) * bn_scale.reshape(2 * H)
                + bn_shift.reshape(2 * H))                          # (2H,)

    seg_dims = [input_dim] + [hidden_dim] * n_layers
    lin1w_pad = jnp.zeros(((n_layers + 1) * P, 2 * H), jnp.float32)
    off = 0
    for l, d in enumerate(seg_dims):          # segment l at rows [l*P, l*P+d)
        lin1w_pad = lin1w_pad.at[l * P: l * P + d].set(lin1_W_f[off:off + d])
        off += d

    head = jnp.stack([
        lin1_b_f,
        params["lin2_W"].reshape(2 * H) / float(num_nodes),   # mean-pool folded in
        jnp.full((2 * H,), params["lin2_b"].reshape(()), jnp.float32),
    ])                                                              # (3, 2H)

    kernel = functools.partial(_critic_kernel, n_layers, hidden_dim,
                               num_nodes, b_tile)

    out = pl.pallas_call(
        kernel,
        out_shape=jax.ShapeDtypeStruct((num_tiles, b_tile, OUT_LANES),
                                       jnp.float32),
        grid=(num_tiles,),
        in_specs=[
            pl.BlockSpec((b_tile, num_nodes, P), lambda b: (b, 0, 0)),
            pl.BlockSpec(A_blk.shape, lambda b: (0, 0)),
            pl.BlockSpec(convw.shape, lambda b: (0, 0, 0)),
            pl.BlockSpec(convv.shape, lambda b: (0, 0, 0)),
            pl.BlockSpec(lin1w_pad.shape, lambda b: (0, 0)),
            pl.BlockSpec(head.shape, lambda b: (0, 0)),
        ],
        out_specs=pl.BlockSpec((1, b_tile, OUT_LANES), lambda b: (b, 0, 0)),
        compiler_params=pltpu.CompilerParams(
            dimension_semantics=("parallel",)),
    )(x, A_blk, convw, convv, lin1w_pad, head)

    vals = out[:, :, 0].reshape(num_tiles * b_tile)[:batch]
    return vals.reshape(batch, 1)


def init_params(key, input_dim, hidden_dim, n_layers):
    """Deterministic PyTorch-default-style init (uniform +/- 1/sqrt(fan_in))."""
    params = {}
    dims = [input_dim] + [hidden_dim] * n_layers
    keys = jax.random.split(key, 2 * n_layers + 4)
    ki = 0
    for l in range(n_layers):
        fan_in = dims[l]
        k = 1.0 / (fan_in ** 0.5)
        params[f"conv{l}_W"] = jax.random.uniform(
            keys[ki], (fan_in, hidden_dim), jnp.float32, -k, k); ki += 1
        params[f"conv{l}_b"] = jax.random.uniform(
            keys[ki], (1, hidden_dim), jnp.float32, -k, k); ki += 1
        params[f"conv{l}_ln_g"] = jnp.ones((1, hidden_dim), jnp.float32)
        params[f"conv{l}_ln_b"] = jnp.zeros((1, hidden_dim), jnp.float32)

    mid_dim = input_dim + n_layers * hidden_dim
    out1 = 2 * hidden_dim
    k = 1.0 / (mid_dim ** 0.5)
    params["lin1_W"] = jax.random.uniform(
        keys[ki], (mid_dim, out1), jnp.float32, -k, k); ki += 1
    params["lin1_b"] = jax.random.uniform(
        keys[ki], (1, out1), jnp.float32, -k, k); ki += 1

    # BatchNorm1d eval: weight=1, bias=0, running_mean=0, running_var=1.
    params["bn_scale"] = jnp.ones((1, out1), jnp.float32) / jnp.sqrt(1.0 + BN_EPS)
    params["bn_shift"] = jnp.zeros((1, out1), jnp.float32)

    k = 1.0 / (out1 ** 0.5)
    params["lin2_W"] = jax.random.uniform(
        keys[ki], (out1, 1), jnp.float32, -k, k); ki += 1
    params["lin2_b"] = jax.random.uniform(
        keys[ki], (1, 1), jnp.float32, -k, k); ki += 1
    return params


def reference_forward(obs, dist_matrix, params, *, gridsize, input_dim,
                      hidden_dim, n_layers):
    """Pure-JAX reference (unfolded) for correctness checking."""
    num_nodes = gridsize * gridsize
    x = obs.reshape(-1, num_nodes, input_dim).astype(jnp.float32)
    A = (dist_matrix == 1).astype(jnp.float32)
    feats = [x]
    h = x
    for l in range(n_layers):
        agg = jnp.einsum("ij,bjf->bif", A, h)
        z = agg @ params[f"conv{l}_W"] + params[f"conv{l}_b"]
        mu = z.mean(-1, keepdims=True)
        var = ((z - mu) ** 2).mean(-1, keepdims=True)
        z = (z - mu) / jnp.sqrt(var + LN_EPS)
        z = z * params[f"conv{l}_ln_g"] + params[f"conv{l}_ln_b"]
        h = jax.nn.relu(z)
        feats.append(h)
    cat = jnp.concatenate(feats, axis=-1)
    y = cat @ params["lin1_W"] + params["lin1_b"]
    y = y * params["bn_scale"] + params["bn_shift"]
    y = jax.nn.relu(y)
    z = y @ params["lin2_W"] + params["lin2_b"]      # (B, N, 1)
    return z.mean(axis=1)                            # (B, 1)


if __name__ == "__main__":
    gridsize = 4
    input_dim = 4
    hidden_dim = 32
    n_layers = 2
    batch = 8
    b_tile = 4            # 4 graphs per grid step, 2 parallel grid steps
    num_nodes = gridsize * gridsize

    key = jax.random.PRNGKey(0)
    k_obs, k_params = jax.random.split(key)

    # observations['obs'] : (batch, num_nodes * input_dim)
    obs = jax.random.normal(k_obs, (batch, num_nodes * input_dim), jnp.float32)

    # Manhattan distance matrix on a gridsize x gridsize grid:
    # dist == 1 gives the 4-neighbour adjacency used by the GNN.
    coords = jnp.stack(
        jnp.meshgrid(jnp.arange(gridsize), jnp.arange(gridsize), indexing="ij"),
        axis=-1).reshape(-1, 2)
    dist_matrix = jnp.abs(
        coords[:, None, :] - coords[None, :, :]).sum(-1).astype(jnp.float32)

    params = init_params(k_params, input_dim, hidden_dim, n_layers)

    out = nagnn_critic_forward(
        obs, dist_matrix, params,
        gridsize=gridsize, input_dim=input_dim,
        hidden_dim=hidden_dim, n_layers=n_layers, b_tile=b_tile)
    out = jax.block_until_ready(out)

    ref = reference_forward(
        obs, dist_matrix, params,
        gridsize=gridsize, input_dim=input_dim,
        hidden_dim=hidden_dim, n_layers=n_layers)

    assert out.shape == (batch, 1), out.shape
    assert jnp.allclose(out, ref, atol=1e-4, rtol=1e-4), (out, ref)
    print("KERNEL_OK")
</pallas_src>

<mosaic_0001>
module attributes {stable_mosaic.version = 11 : i64} {
  func.func @_critic_kernel(%arg0: i32, %arg1: memref<4x16x32xf32, #tpu.memory_space<vmem>>, %arg2: memref<64x64xf32, #tpu.memory_space<vmem>>, %arg3: memref<2x32x32xf32, #tpu.memory_space<vmem>>, %arg4: memref<2x3x32xf32, #tpu.memory_space<vmem>>, %arg5: memref<96x64xf32, #tpu.memory_space<vmem>>, %arg6: memref<3x64xf32, #tpu.memory_space<vmem>>, %arg7: memref<1x4x128xf32, #tpu.memory_space<vmem>>) attributes {dimension_semantics = [#tpu.dimension_semantics<parallel>], iteration_bounds = array<i64: 2>, scalar_prefetch = 0 : i64, scratch_operands = 0 : i64, tpu.core_type = #tpu.core_type<tc>, window_params = [{transform_indices = @transform_0, window_bounds = array<i64: 4, 16, 32>}, {pipeline_mode = #tpu.pipeline_mode<synchronous>, transform_indices = @transform_1, window_bounds = array<i64: 64, 64>}, {pipeline_mode = #tpu.pipeline_mode<synchronous>, transform_indices = @transform_2, window_bounds = array<i64: 2, 32, 32>}, {pipeline_mode = #tpu.pipeline_mode<synchronous>, transform_indices = @transform_3, window_bounds = array<i64: 2, 3, 32>}, {pipeline_mode = #tpu.pipeline_mode<synchronous>, transform_indices = @transform_4, window_bounds = array<i64: 96, 64>}, {pipeline_mode = #tpu.pipeline_mode<synchronous>, transform_indices = @transform_5, window_bounds = array<i64: 3, 64>}, {transform_indices = @transform_6, window_bounds = array<i64: 1, 4, 128>}]} {
    %c0 = arith.constant 0 : index
    %c0_0 = arith.constant 0 : index
    %c0_1 = arith.constant 0 : index
    %0 = vector.load %arg1[%c0, %c0_0, %c0_1] : memref<4x16x32xf32, #tpu.memory_space<vmem>>, vector<4x16x32xf32>
    %1 = vector.shape_cast %0 : vector<4x16x32xf32> to vector<64x32xf32>
    %c0_2 = arith.constant 0 : index
    %c0_3 = arith.constant 0 : index
    %2 = vector.load %arg2[%c0_2, %c0_3] : memref<64x64xf32, #tpu.memory_space<vmem>>, vector<64x64xf32>
    %c0_4 = arith.constant 0 : index
    %c0_5 = arith.constant 0 : index
    %3 = vector.load %arg6[%c0_4, %c0_5] : memref<3x64xf32, #tpu.memory_space<vmem>>, vector<3x64xf32>
    %4 = vector.extract_strided_slice %3 {offsets = [0, 0], sizes = [1, 64], strides = [1, 1]} : vector<3x64xf32> to vector<1x64xf32>
    %5 = vector.extract_strided_slice %3 {offsets = [1, 0], sizes = [1, 64], strides = [1, 1]} : vector<3x64xf32> to vector<1x64xf32>
    %6 = vector.extract_strided_slice %3 {offsets = [2, 0], sizes = [1, 1], strides = [1, 1]} : vector<3x64xf32> to vector<1x1xf32>
    %c0_6 = arith.constant 0 : index
    %c0_7 = arith.constant 0 : index
    %7 = vector.load %arg5[%c0_6, %c0_7] : memref<96x64xf32, #tpu.memory_space<vmem>>, vector<32x64xf32>
    %cst = arith.constant dense<0.000000e+00> : vector<64x64xf32>
    %8 = tpu.matmul %1, %7, %cst {dimension_numbers = #tpu.dot_dimension_numbers<[1], [0], [0], [1], [0, 0, 1, 1], [], []>} : vector<64x32xf32>, vector<32x64xf32>, vector<64x64xf32> -> vector<64x64xf32>
    %9 = vector.broadcast %4 : vector<1x64xf32> to vector<64x64xf32>
    %10 = arith.addf %8, %9 : vector<64x64xf32>
    %c0_8 = arith.constant 0 : index
    %c0_9 = arith.constant 0 : index
    %c0_10 = arith.constant 0 : index
    %11 = vector.load %arg4[%c0_8, %c0_9, %c0_10] : memref<2x3x32xf32, #tpu.memory_space<vmem>>, vector<1x3x32xf32>
    %12 = vector.shape_cast %11 : vector<1x3x32xf32> to vector<3x32xf32>
    %cst_11 = arith.constant dense<0.000000e+00> : vector<64x32xf32>
    %13 = tpu.matmul %2, %1, %cst_11 {dimension_numbers = #tpu.dot_dimension_numbers<[1], [0], [0], [1], [0, 0, 1, 1], [], []>} : vector<64x64xf32>, vector<64x32xf32>, vector<64x32xf32> -> vector<64x32xf32>
    %c0_12 = arith.constant 0 : index
    %c0_13 = arith.constant 0 : index
    %c0_14 = arith.constant 0 : index
    %14 = vector.load %arg3[%c0_12, %c0_13, %c0_14] : memref<2x32x32xf32, #tpu.memory_space<vmem>>, vector<1x32x32xf32>
    %15 = vector.shape_cast %14 : vector<1x32x32xf32> to vector<32x32xf32>
    %cst_15 = arith.constant dense<0.000000e+00> : vector<64x32xf32>
    %16 = tpu.matmul %13, %15, %cst_15 {dimension_numbers = #tpu.dot_dimension_numbers<[1], [0], [0], [1], [0, 0, 1, 1], [], []>} : vector<64x32xf32>, vector<32x32xf32>, vector<64x32xf32> -> vector<64x32xf32>
    %17 = vector.extract_strided_slice %12 {offsets = [0, 0], sizes = [1, 32], strides = [1, 1]} : vector<3x32xf32> to vector<1x32xf32>
    %18 = vector.broadcast %17 : vector<1x32xf32> to vector<64x32xf32>
    %19 = arith.addf %16, %18 : vector<64x32xf32>
    %cst_16 = arith.constant dense<0.000000e+00> : vector<64xf32>
    %20 = vector.multi_reduction <add>, %19, %cst_16 [1] : vector<64x32xf32> to vector<64xf32>
    %21 = vector.shape_cast %20 : vector<64xf32> to vector<64x1xf32>
    %cst_17 = arith.constant 3.200000e+01 : f32
    %22 = vector.broadcast %cst_17 : f32 to vector<64x1xf32>
    %23 = arith.divf %21, %22 : vector<64x1xf32>
    %24 = vector.broadcast %23 : vector<64x1xf32> to vector<64x32xf32>
    %25 = arith.subf %19, %24 : vector<64x32xf32>
    %26 = arith.mulf %25, %25 : vector<64x32xf32>
    %cst_18 = arith.constant dense<0.000000e+00> : vector<64xf32>
    %27 = vector.multi_reduction <add>, %26, %cst_18 [1] : vector<64x32xf32> to vector<64xf32>
    %28 = vector.shape_cast %27 : vector<64xf32> to vector<64x1xf32>
    %cst_19 = arith.constant 3.200000e+01 : f32
    %29 = vector.broadcast %cst_19 : f32 to vector<64x1xf32>
    %30 = arith.divf %28, %29 : vector<64x1xf32>
    %31 = vector.broadcast %23 : vector<64x1xf32> to vector<64x32xf32>
    %32 = arith.subf %19, %31 : vector<64x32xf32>
    %cst_20 = arith.constant 9.99999974E-6 : f32
    %33 = vector.broadcast %cst_20 : f32 to vector<64x1xf32>
    %34 = arith.addf %30, %33 : vector<64x1xf32>
    %35 = math.rsqrt %34 : vector<64x1xf32>
    %36 = vector.broadcast %35 : vector<64x1xf32> to vector<64x32xf32>
    %37 = arith.mulf %32, %36 : vector<64x32xf32>
    %38 = vector.extract_strided_slice %12 {offsets = [1, 0], sizes = [1, 32], strides = [1, 1]} : vector<3x32xf32> to vector<1x32xf32>
    %39 = vector.broadcast %38 : vector<1x32xf32> to vector<64x32xf32>
    %40 = arith.mulf %37, %39 : vector<64x32xf32>
    %41 = vector.extract_strided_slice %12 {offsets = [2, 0], sizes = [1, 32], strides = [1, 1]} : vector<3x32xf32> to vector<1x32xf32>
    %42 = vector.broadcast %41 : vector<1x32xf32> to vector<64x32xf32>
    %43 = arith.addf %40, %42 : vector<64x32xf32>
    %cst_21 = arith.constant 0.000000e+00 : f32
    %44 = vector.broadcast %cst_21 : f32 to vector<64x32xf32>
    %45 = arith.maximumf %43, %44 : vector<64x32xf32>
    %c32 = arith.constant 32 : index
    %c0_22 = arith.constant 0 : index
    %46 = vector.load %arg5[%c32, %c0_22] : memref<96x64xf32, #tpu.memory_space<vmem>>, vector<32x64xf32>
    %cst_23 = arith.constant dense<0.000000e+00> : vector<64x64xf32>
    %47 = tpu.matmul %45, %46, %cst_23 {dimension_numbers = #tpu.dot_dimension_numbers<[1], [0], [0], [1], [0, 0, 1, 1], [], []>} : vector<64x32xf32>, vector<32x64xf32>, vector<64x64xf32> -> vector<64x64xf32>
    %48 = arith.addf %10, %47 : vector<64x64xf32>
    %c1 = arith.constant 1 : index
    %c0_24 = arith.constant 0 : index
    %c0_25 = arith.constant 0 : index
    %49 = vector.load %arg4[%c1, %c0_24, %c0_25] : memref<2x3x32xf32, #tpu.memory_space<vmem>>, vector<1x3x32xf32>
    %50 = vector.shape_cast %49 : vector<1x3x32xf32> to vector<3x32xf32>
    %cst_26 = arith.constant dense<0.000000e+00> : vector<64x32xf32>
    %51 = tpu.matmul %2, %45, %cst_26 {dimension_numbers = #tpu.dot_dimension_numbers<[1], [0], [0], [1], [0, 0, 1, 1], [], []>} : vector<64x64xf32>, vector<64x32xf32>, vector<64x32xf32> -> vector<64x32xf32>
    %c1_27 = arith.constant 1 : index
    %c0_28 = arith.constant 0 : index
    %c0_29 = arith.constant 0 : index
    %52 = vector.load %arg3[%c1_27, %c0_28, %c0_29] : memref<2x32x32xf32, #tpu.memory_space<vmem>>, vector<1x32x32xf32>
    %53 = vector.shape_cast %52 : vector<1x32x32xf32> to vector<32x32xf32>
    %cst_30 = arith.constant dense<0.000000e+00> : vector<64x32xf32>
    %54 = tpu.matmul %51, %53, %cst_30 {dimension_numbers = #tpu.dot_dimension_numbers<[1], [0], [0], [1], [0, 0, 1, 1], [], []>} : vector<64x32xf32>, vector<32x32xf32>, vector<64x32xf32> -> vector<64x32xf32>
    %55 = vector.extract_strided_slice %50 {offsets = [0, 0], sizes = [1, 32], strides = [1, 1]} : vector<3x32xf32> to vector<1x32xf32>
    %56 = vector.broadcast %55 : vector<1x32xf32> to vector<64x32xf32>
    %57 = arith.addf %54, %56 : vector<64x32xf32>
    %cst_31 = arith.constant dense<0.000000e+00> : vector<64xf32>
    %58 = vector.multi_reduction <add>, %57, %cst_31 [1] : vector<64x32xf32> to vector<64xf32>
    %59 = vector.shape_cast %58 : vector<64xf32> to vector<64x1xf32>
    %cst_32 = arith.constant 3.200000e+01 : f32
    %60 = vector.broadcast %cst_32 : f32 to vector<64x1xf32>
    %61 = arith.divf %59, %60 : vector<64x1xf32>
    %62 = vector.broadcast %61 : vector<64x1xf32> to vector<64x32xf32>
    %63 = arith.subf %57, %62 : vector<64x32xf32>
    %64 = arith.mulf %63, %63 : vector<64x32xf32>
    %cst_33 = arith.constant dense<0.000000e+00> : vector<64xf32>
    %65 = vector.multi_reduction <add>, %64, %cst_33 [1] : vector<64x32xf32> to vector<64xf32>
    %66 = vector.shape_cast %65 : vector<64xf32> to vector<64x1xf32>
    %cst_34 = arith.constant 3.200000e+01 : f32
    %67 = vector.broadcast %cst_34 : f32 to vector<64x1xf32>
    %68 = arith.divf %66, %67 : vector<64x1xf32>
    %69 = vector.broadcast %61 : vector<64x1xf32> to vector<64x32xf32>
    %70 = arith.subf %57, %69 : vector<64x32xf32>
    %cst_35 = arith.constant 9.99999974E-6 : f32
    %71 = vector.broadcast %cst_35 : f32 to vector<64x1xf32>
    %72 = arith.addf %68, %71 : vector<64x1xf32>
    %73 = math.rsqrt %72 : vector<64x1xf32>
    %74 = vector.broadcast %73 : vector<64x1xf32> to vector<64x32xf32>
    %75 = arith.mulf %70, %74 : vector<64x32xf32>
    %76 = vector.extract_strided_slice %50 {offsets = [1, 0], sizes = [1, 32], strides = [1, 1]} : vector<3x32xf32> to vector<1x32xf32>
    %77 = vector.broadcast %76 : vector<1x32xf32> to vector<64x32xf32>
    %78 = arith.mulf %75, %77 : vector<64x32xf32>
    %79 = vector.extract_strided_slice %50 {offsets = [2, 0], sizes = [1, 32], strides = [1, 1]} : vector<3x32xf32> to vector<1x32xf32>
    %80 = vector.broadcast %79 : vector<1x32xf32> to vector<64x32xf32>
    %81 = arith.addf %78, %80 : vector<64x32xf32>
    %cst_36 = arith.constant 0.000000e+00 : f32
    %82 = vector.broadcast %cst_36 : f32 to vector<64x32xf32>
    %83 = arith.maximumf %81, %82 : vector<64x32xf32>
    %c64 = arith.constant 64 : index
    %c0_37 = arith.constant 0 : index
    %84 = vector.load %arg5[%c64, %c0_37] : memref<96x64xf32, #tpu.memory_space<vmem>>, vector<32x64xf32>
    %cst_38 = arith.constant dense<0.000000e+00> : vector<64x64xf32>
    %85 = tpu.matmul %83, %84, %cst_38 {dimension_numbers = #tpu.dot_dimension_numbers<[1], [0], [0], [1], [0, 0, 1, 1], [], []>} : vector<64x32xf32>, vector<32x64xf32>, vector<64x64xf32> -> vector<64x64xf32>
    %86 = arith.addf %48, %85 : vector<64x64xf32>
    %cst_39 = arith.constant 0.000000e+00 : f32
    %87 = vector.broadcast %cst_39 : f32 to vector<64x64xf32>
    %88 = arith.maximumf %86, %87 : vector<64x64xf32>
    %89 = vector.shape_cast %88 : vector<64x64xf32> to vector<4x16x64xf32>
    %cst_40 = arith.constant dense<0.000000e+00> : vector<4x64xf32>
    %90 = vector.multi_reduction <add>, %89, %cst_40 [1] : vector<4x16x64xf32> to vector<4x64xf32>
    %91 = vector.broadcast %5 : vector<1x64xf32> to vector<4x64xf32>
    %92 = arith.mulf %90, %91 : vector<4x64xf32>
    %cst_41 = arith.constant dense<0.000000e+00> : vector<4xf32>
    %93 = vector.multi_reduction <add>, %92, %cst_41 [1] : vector<4x64xf32> to vector<4xf32>
    %94 = vector.shape_cast %93 : vector<4xf32> to vector<4x1xf32>
    %95 = vector.broadcast %6 : vector<1x1xf32> to vector<4x1xf32>
    %96 = arith.addf %94, %95 : vector<4x1xf32>
    %97 = vector.shape_cast %96 : vector<4x1xf32> to vector<1x4x1xf32>
    %98 = vector.shape_cast %97 : vector<1x4x1xf32> to vector<1x4x1xf32>
    %99 = vector.broadcast %98 : vector<1x4x1xf32> to vector<1x4x128xf32>
    %c0_42 = arith.constant 0 : index
    %c0_43 = arith.constant 0 : index
    %c0_44 = arith.constant 0 : index
    %100 = vector.load %arg7[%c0_42, %c0_43, %c0_44] : memref<1x4x128xf32, #tpu.memory_space<vmem>>, vector<1x4x128xf32>
    tpu.vector_store %arg7[%c0_42, %c0_43, %c0_44], %99 {strides = array<i32>} : memref<1x4x128xf32, #tpu.memory_space<vmem>>, vector<1x4x128xf32>,
    return
  }
  func.func @transform_0(%arg0: i32) -> (i32, i32, i32) {
    %c0_i32 = arith.constant 0 : i32
    %c0_i32_0 = arith.constant 0 : i32
    %c0_i32_1 = arith.constant 0 : i32
    return %arg0, %c0_i32, %c0_i32_0 : i32, i32, i32
  }
  func.func @transform_1(%arg0: i32) -> (i32, i32) {
    %c0_i32 = arith.constant 0 : i32
    %c0_i32_0 = arith.constant 0 : i32
    %c0_i32_1 = arith.constant 0 : i32
    return %c0_i32, %c0_i32_0 : i32, i32
  }
  func.func @transform_2(%arg0: i32) -> (i32, i32, i32) {
    %c0_i32 = arith.constant 0 : i32
    %c0_i32_0 = arith.constant 0 : i32
    %c0_i32_1 = arith.constant 0 : i32
    %c0_i32_2 = arith.constant 0 : i32
    return %c0_i32, %c0_i32_0, %c0_i32_1 : i32, i32, i32
  }
  func.func @transform_3(%arg0: i32) -> (i32, i32, i32) {
    %c0_i32 = arith.constant 0 : i32
    %c0_i32_0 = arith.constant 0 : i32
    %c0_i32_1 = arith.constant 0 : i32
    %c0_i32_2 = arith.constant 0 : i32
    return %c0_i32, %c0_i32_0, %c0_i32_1 : i32, i32, i32
  }
  func.func @transform_4(%arg0: i32) -> (i32, i32) {
    %c0_i32 = arith.constant 0 : i32
    %c0_i32_0 = arith.constant 0 : i32
    %c0_i32_1 = arith.constant 0 : i32
    return %c0_i32, %c0_i32_0 : i32, i32
  }
  func.func @transform_5(%arg0: i32) -> (i32, i32) {
    %c0_i32 = arith.constant 0 : i32
    %c0_i32_0 = arith.constant 0 : i32
    %c0_i32_1 = arith.constant 0 : i32
    return %c0_i32, %c0_i32_0 : i32, i32
  }
  func.func @transform_6(%arg0: i32) -> (i32, i32, i32) {
    %c0_i32 = arith.constant 0 : i32
    %c0_i32_0 = arith.constant 0 : i32
    %c0_i32_1 = arith.constant 0 : i32
    return %arg0, %c0_i32, %c0_i32_0 : i32, i32, i32
  }
}

</mosaic_0001>

<bundles_post_ra>
// kernel: tpu_custom_call.1
= control target key start
LH: loop header
LB: loop body
LE: loop exit
PB: predicated region body
PF: predicated region fallthrough
CT: control target
= control target key end

     0   :  { %11 = vsyncpa [#allocation3], 0  ;;  %s2277_s0 = inlined_call_operand.vmem [shape: f32[8,16,32], index: 0, kind: input, shape index: {}]   ;;  %s2278_s1 = inlined_call_operand.hbm [shape: f32[64,64], index: 1, kind: input, shape index: {}]   ;;  %s2279_s2 = inlined_call_operand.hbm [shape: f32[2,32,32], index: 2, kind: input, shape index: {}]   ;;  %s2280_s3 = inlined_call_operand.vmem [shape: f32[2,3,32], index: 3, kind: input, shape index: {}]   ;;  %s2281_s4 = inlined_call_operand.vmem [shape: f32[96,64], index: 4, kind: input, shape index: {}]   ;;  %s2282_s5 = inlined_call_operand.vmem [shape: f32[3,64], index: 5, kind: input, shape index: {}]   ;;  %s2283_s6 = inlined_call_operand.hbm [shape: f32[2,4,128], index: 6, kind: output, shape index: {}]  }
   0x1   :  { %12 = vsyncpa [#allocation6], 0 }
   0x2   :  { %13 = vsyncpa [#allocation4], 0 }
   0x3   :  { %15 = vsyncpa [#allocation4 + $0x1], 0  ;;  %s1723_s21 = smov 0   ;;  %s1725_s22 = smov 0  }
   0x4   :  { %s1727_s23 = smov 0   ;;  %s1729_s24 = smov 0  }
   0x5 LB: > { %s1744_s25 = sadd.s32 4294967295, %s1680_s24   ;;  %s1365_s26 = sadd.s32 4294967294, %s1680_s24   ;;  %s1680_s24 = sphi %s1729_s24, %s2294_s24   ;;  %s1676_s23 = sphi %s1727_s23, %s2293_s23   ;;  %s1672_s22 = sphi %s1725_s22, %s2292_s22   ;;  %s1668_s21 = sphi %s1723_s21, %s2291_s21  }
   0x6   : > { %s1748_s27 = sadd.s32 1, %s1680_s24   ;;  %s159_s28 = sadd.s32 1, %s1676_s23 }
   0x7   : > { %s156_s29 = ssub.s32 %s1680_s24, %s1748_s27  ;;  %p169_p0 = scmp.ne.s32.totalorder %s1676_s23, %s1672_s22 }
   0x8   : > { %p157_p1 = scmp.eq.s32.totalorder %s156_s29, 0  ;;  %p170_p2 = scmp.eq.s32.totalorder %s1744_s25, 1 }
   0x9   : > { %p175_p3 = scmp.ne.s32.totalorder %s1672_s22, %s1668_s21  ;;  %p176_p4 = scmp.eq.s32.totalorder %s1365_s26, 1 }
   0xa   : > { %s1759_s30 = scalar_select %p157_p1, %s1676_s23, %s159_s28  }
   0xb   : > { %p1761_p5 = por %p170_p2, %p169_p0  ;;  %p1765_p6 = por %p176_p4, %p175_p3 }
   0xc   : > { %p1366_p7 = scmp.ge.s32.totalorder %s1680_s24, 1  ;;  %p183_p8 = scmp.lt.s32.totalorder %s1680_s24, 3 }
   0xd   : > { %p1472_p9 = scmp.eq.s32.totalorder %s1744_s25, 0  ;;  %s194_s12 = sshll.u32 %s2278_s1, 4  ;;  %s195_s12 = int_to_ptr.hbm [resolvable:$true] %s194_s12 }
   0xe   : > { %p1772_p10 = pnand %p1366_p7, %p183_p8  ;;  %s1682_s13 = smov [#allocation2]  }
   0xf   : > { %s196_s14 = sshll.u32 %s1682_s13, 4  ;;  %s208_s17 = sshll.u32 %s2279_s2, 4  ;;  %s197_s14 = int_to_ptr.vmem [resolvable:$true] %s196_s14  ;;  %s209_s17 = int_to_ptr.hbm [resolvable:$true] %s208_s17 }
  0x10   : > { %p1461_p11 = pneg %p1772_p10  ;;  %s1683_s18 = smov 128  }
  0x11   : > { %s1684_s19 = smov 8   ;;  %s1685_s20 = smov [#allocation5]  }
  0x12   : > { %p1462_p12 = pnand %p1472_p9, %p1461_p11  ;;  %s210_s26 = sshll.u32 %s1685_s20, 4  ;;  %s211_s26 = int_to_ptr.vmem [resolvable:$true] %s210_s26 }
  0x13   : > { %245 = sbr.rel (%p1772_p10) target bundleno = 1744 (0x6d0), region = 44 }
  0x14   : > { %1464 = dma.hbm_to_vmem [thread:$0]  (!%p1462_p12), %s195_s12, 1024, %s197_s14, [#allocation3], %s1683_s18, %s1683_s18, %s1684_s19  }
  0x15   : > { %1467 = dma.hbm_to_vmem [thread:$0]  (!%p1462_p12), %s209_s17, 1024, %s211_s26, [#allocation6], %s1683_s18, %s1683_s18, %s1684_s19  }
  0x18   : > { %1655 = dma.done.wait (%p1472_p9), [#allocation3], 1024  }
  0x19   : > { %1657 = vsyncadd (%p1472_p9), [#allocation3], 4294966272 }
  0x1a   : > { %1659 = dma.done.wait (%p1472_p9), [#allocation6], 1024  }
  0x1b   : > { %1661 = vsyncadd (%p1472_p9), [#allocation6], 4294966272  ;;  %s1797_s28 = sshll.u32 %s1744_s25, 2  ;;  %v309_v0 = vld [vmem:[%s2281_s4 + $0x18] sm:$0xff]  ;;  %v308_v1 = vld [vmem:[%s2281_s4 + $0x10] sm:$0xff]  ;;  %vm311_vm0 = vcmask 261120  }
  0x1c   : > { %p283_p13 = scmp.lt.s32.totalorder %s1797_s28, 7  ;;  %1439 = vmatpush.msra.mxu1 %v309_v0  ;;  %348 = vmatpush.msra.mxu0 %v309_v0  ;;  %v307_v2 = vld [vmem:[%s2281_s4 + $0x8] sm:$0xff]  ;;  %v306_v3 = vld [vmem:[%s2281_s4] sm:$0xff]  ;;  %vm378_vm1 = vcmask 523264   ;;  %v1832_v14 = vld [vmem:[#allocation2 + $0x10] sm:$0xff]  ;;  %s279_s13 = sand.u32 1, %s1672_s22  }
  0x1d   : > { %v1824_v12 = vld [vmem:[#allocation2] sm:$0xff]  ;;  %v1828_v13 = vld [vmem:[#allocation2 + $0x8] sm:$0xff]  ;;  %v1836_v15 = vld [vmem:[#allocation2 + $0x18] sm:$0xff]  ;;  %s1373_s14 = sshll.u32 %s279_s13, 2  ;;  %s1279_s16 = scalar_lea.hbm %s2283_s6, %s1797_s28 }
  0x1e   : > { %s284_s29 = scalar_select %p283_p13, %s1797_s28, 7  ;;  %1440 = vmatpush.msra.mxu1 %v308_v1  ;;  %349 = vmatpush.msra.mxu0 %v308_v1  ;;  %v1840_v16 = vld [vmem:[#allocation2 + $0x20] sm:$0xff]  ;;  %v1844_v17 = vld [vmem:[#allocation2 + $0x28] sm:$0xff]  ;;  %v1848_v18 = vld [vmem:[#allocation2 + $0x30] sm:$0xff] }
  0x1f   : > { %v1852_v19 = vld [vmem:[#allocation2 + $0x38] sm:$0xff]  ;;  %v446_v23 = vld [vmem:[#allocation5 + $0x10] sm:$0xff]  ;;  %v445_v24 = vld [vmem:[#allocation5 + $0x8] sm:$0xff]  ;;  %s1283_s19 = sshll.u32 %s1279_s16, 4  ;;  %s1269_s20 = scalar_lea.sflag [#allocation4], %s279_s13  ;;  %s1284_s19 = int_to_ptr.hbm [resolvable:$true] %s1283_s19 }
  0x20   : > { %s1438_s9 = sshll.u32 %s284_s29, 4  ;;  %1441 = vmatpush.msra.mxu1 %v307_v2  ;;  %350 = vmatpush.msra.mxu0 %v307_v2  ;;  %v447_v22 = vld [vmem:[#allocation5 + $0x18] sm:$0xff]  ;;  %v444_v25 = vld [vmem:[#allocation5] sm:$0xff]  ;;  %v1686_v2 = vmov 32.0   ;;  %s1624_s26 = sshra.s32 %s1284_s19, 4  ;;  %s1625_s26 = int_to_ptr.hbm [resolvable:$true] %s1624_s26 }
  0x21   : > { %s287_s17 = scalar_lea.vmem %s2277_s0, %s1438_s9  ;;  %1443 = vmatpush.msra.mxu2 %v447_v22  ;;  %v1883_v40 = vld [vmem:[%s2280_s3] sm:$0x7]  ;;  %1516 = vrcp.f32 %v1686_v2  ;;  %s1626_s29 = scalar_lea.hbm %s1625_s26, 4 }
  0x22   : > { %v291_v4 = vld [vmem:[%s287_s17 + $0x10] sm:$0xff]  ;;  %v296_v5 = vld [vmem:[%s287_s17 + $0x38] sm:$0xff]  ;;  %1442 = vmatpush.msra.mxu1 %v306_v3  ;;  %351 = vmatpush.msra.mxu0 %v306_v3  ;;  %v294_v7 = vld [vmem:[%s287_s17 + $0x28] sm:$0xff]  ;;  %v448_v41 = vperm.slane %v1883_v40, 0  ;;  %p1627_p0 = scmp.ne.s32.totalorder %s1625_s26, %s1626_s29  ;;  %s1630_s11 = scalar_lea.hbm %s2283_s6, 8 }
  0x23   : > { %1379 = vmatmul.msk.f32.vlgmr.msra.gmra.mxu1 %vm311_vm0, %v291_v4  ;;  %v295_v6 = vld [vmem:[%s287_s17 + $0x30] sm:$0xff]  ;;  %v292_v8 = vld [vmem:[%s287_s17 + $0x18] sm:$0xff]  ;;  %v293_v9 = vld [vmem:[%s287_s17 + $0x20] sm:$0xff]  ;;  %1444 = vmatpush.msra.mxu2 %v446_v23  ;;  %p1631_p3 = scmp.lt.s32.totalorder %s1625_s26, %s2283_s6  ;;  %p1632_p4 = scmp.lt.s32.totalorder %s1630_s11, %s1626_s29 }
  0x24   : > { %411 = vmatpush.msrb.mxu1 %v296_v5  ;;  %v289_v10 = vld [vmem:[%s287_s17] sm:$0xff]  ;;  %v290_v11 = vld [vmem:[%s287_s17 + $0x8] sm:$0xff]  ;;  %485 = vmatpush.msrb.mxu0 %v447_v22  ;;  %s281_s17 = scalar_lea.vmem [#allocation7], %s1373_s14  ;;  %p1628_p1 = pnand %p1627_p0, %p1761_p5 }
  0x25   : > { %1377 = vmatmul.msk.f32.vlgmr.msra.gmra.mxu0 %vm311_vm0, %v289_v10  ;;  %1445 = vmatpush.msra.mxu2 %v445_v24  ;;  %s1281_s18 = sshll.u32 %s281_s17, 4  ;;  %p1633_p7 = por %p1632_p4, %p1631_p3  ;;  %s1282_s18 = int_to_ptr.vmem [resolvable:$true] %s1281_s18 }
  0x26   : > { %412 = vmatpush.msrb.mxu1 %v295_v6  ;;  %486 = vmatpush.msrb.mxu0 %v446_v23  ;;  %p1629_p2 = pneg %p1628_p1 }
  0x27   : > { %1446 = vmatpush.msra.mxu2 %v444_v25  ;;  %v1517_v3 = vpop.eup %1516 }
  0x28   : > { %413 = vmatpush.msrb.mxu1 %v294_v7  ;;  %487 = vmatpush.msrb.mxu0 %v445_v24  ;;  %vm543_vm2 = vweird.f32 %v1517_v3  ;;  %p1634_p8 = pnand %p1633_p7, %p1629_p2 }
  0x2a   : > { %414 = vmatpush.msrb.mxu1 %v293_v9  ;;  %488 = vmatpush.msrb.mxu0 %v444_v25 }
  0x2b   : > { %1380 = vmatmul.msk.f32.gmra.mxu1 %vm311_vm0, %v292_v8 }
  0x2c   : > { %415 = vmatpush.msrb.mxu1 %v292_v8 }
  0x2d   : > { %1378 = vmatmul.msk.f32.gmra.mxu0 %vm311_vm0, %v290_v11 }
  0x2e   : > { %416 = vmatpush.msrb.mxu1 %v291_v4  ;;  %v539_v4 = vmul.f32 32.0, %v1517_v3 }
  0x30   : > { %417 = vmatpush.msrb.mxu1 %v290_v11 }
  0x32   : > { %418 = vmatpush.msrb.mxu1 %v289_v10 }
  0x33   : > { %1381 = vmatmul.msk.f32.gmra.mxu1 %vm311_vm0, %v293_v9 }
  0x3b   : > { %1382 = vmatmul.msk.f32.gmra.mxu1 %vm311_vm0, %v294_v7 }
  0x43   : > { %1383 = vmatmul.msk.f32.gmra.mxu1 %vm311_vm0, %v295_v6 }
  0x4b   : > { %1384 = vmatmul.msk.f32.gmra.mxu1 %vm311_vm0, %v296_v5  ;;  %v540_v5 = vsub.f32 1.0, %v539_v4  ;;  %v724_v4 = vld [vmem:[%s2281_s4 + $0x28] sm:$0xff] }
  0x4d   : > { %v541_v6 = vmul.f32 %v1517_v3, %v540_v5  ;;  %v723_v5 = vld [vmem:[%s2281_s4 + $0x20] sm:$0xff] }
  0x4f   : > { %v542_v7 = vadd.f32 %v1517_v3, %v541_v6 }
  0x51   : > { %v1894_v8 = vsel %vm543_vm2, %v1517_v3, %v542_v7  ;;  %v726_v3 = vld [vmem:[%s2281_s4 + $0x38] sm:$0xff] }
  0x52   : > { %763 = vmatpush.msra.mxu0 %v726_v3  ;;  %1447 = vmatpush.msra.mxu3 %v726_v3 }
  0x53   : > { %1385 = vmatmul.msk.f32.vlgmr.msrb.gmra.mxu1 %vm378_vm1, %v1824_v12 }
  0x5b   : > { %1386 = vmatmul.msk.f32.gmra.mxu1 %vm378_vm1, %v1828_v13 }
  0x63   : > { %1387 = vmatmul.msk.f32.gmra.mxu1 %vm378_vm1, %v1832_v14 }
  0x6b   : > { %1388 = vmatmul.msk.f32.gmra.mxu1 %vm378_vm1, %v1836_v15 }
  0x73   : > { %1389 = vmatmul.msk.f32.gmra.mxu1 %vm378_vm1, %v1840_v16 }
  0x7b   : > { %1390 = vmatmul.msk.f32.gmra.mxu1 %vm378_vm1, %v1844_v17 }
  0x83   : > { %1391 = vmatmul.msk.f32.gmra.mxu1 %vm378_vm1, %v1848_v18 }
  0x8b   : > { %1392 = vmatmul.msk.f32.gmra.mxu1 %vm378_vm1, %v1852_v19 }
  0xa0   : > { %v1856_v20 = vpop.f32.mrf.mxu1 }
  0xa2   : > { %v1876_v38 = vpop.f32.mrf.mxu0 }
  0xa8   : > { %v1858_v21 = vpop.f32.mrf.mxu1 }
  0xaa   : > { %v1878_v39 = vpop.f32.mrf.mxu0 }
  0xb0   : > { %v1860_v26 = vpop.f32.mrf.mxu1 }
  0xb8   : > { %v1862_v27 = vpop.f32.mrf.mxu1 }
  0xc0   : > { %v1864_v28 = vpop.f32.mrf.mxu1 }
  0xc8   : > { %v1866_v29 = vpop.f32.mrf.mxu1 }
  0xd0   : > { %v420_v30 = vpop.f32.mrf.mxu1 }
  0xd1   : > { %1393 = vmatmul.msk.f32.vlgmr.msrb.gmra.mxu0 %vm311_vm0, %v420_v30 }
  0xd8   : > { %v423_v31 = vpop.f32.mrf.mxu1 }
  0xd9   : > { %1394 = vmatmul.msk.f32.gmra.mxu0 %vm311_vm0, %v423_v31 }
  0xe0   : > { %v426_v32 = vpop.f32.mrf.mxu1 }
  0xe1   : > { %1395 = vmatmul.msk.f32.vlgmr.msra.gmra.mxu2 %vm311_vm0, %v426_v32 }
  0xe8   : > { %v429_v33 = vpop.f32.mrf.mxu1 }
  0xe9   : > { %1396 = vmatmul.msk.f32.gmra.mxu2 %vm311_vm0, %v429_v33 }
  0xf0   : > { %v432_v34 = vpop.f32.mrf.mxu1 }
  0xf1   : > { %1397 = vmatmul.msk.f32.gmra.mxu2 %vm311_vm0, %v432_v34 }
  0xf8   : > { %v435_v35 = vpop.f32.mrf.mxu1 }
  0xf9   : > { %1398 = vmatmul.msk.f32.gmra.mxu2 %vm311_vm0, %v435_v35 }
 0x100   : > { %v438_v36 = vpop.f32.mrf.mxu1 }
 0x101   : > { %1399 = vmatmul.msk.f32.gmra.mxu2 %vm311_vm0, %v438_v36 }
 0x108   : > { %v441_v37 = vpop.f32.mrf.mxu1 }
 0x109   : > { %1400 = vmatmul.msk.f32.gmra.mxu2 %vm311_vm0, %v441_v37 }
 0x14e   : > { %v490_v42 = vpop.f32.mrf.mxu0 }
 0x14f   : > { %v491_v43 = vadd.f32 %v490_v42, %v448_v41 }
 0x151   : > { %v514_v44 = vsel %vm311_vm0, %v491_v43, 0.0 }
 0x152   : > { %515 = vadd.xlane.f32.xlu0 %v514_v44 }
 0x156   : > { %v493_v50 = vpop.f32.mrf.mxu0 }
 0x157   : > { %v494_v51 = vadd.f32 %v493_v50, %v448_v41 }
 0x159   : > { %v517_v55 = vsel %vm311_vm0, %v494_v51, 0.0 }
 0x164   : > { %v496_v45 = vpop.f32.mrf.mxu2 }
 0x165   : > { %v497_v59 = vadd.f32 %v496_v45, %v448_v41 }
 0x167   : > { %v520_v62 = vsel %vm311_vm0, %v497_v59, 0.0 }
 0x16c   : > { %v499_v46 = vpop.f32.mrf.mxu2 }
 0x16d   : > { %v500_v0 = vadd.f32 %v499_v46, %v448_v41 }
 0x16f   : > { %v523_v1 = vsel %vm311_vm0, %v500_v0, 0.0 }
 0x174   : > { %v502_v47 = vpop.f32.mrf.mxu2 }
 0x175   : > { %v503_v48 = vadd.f32 %v502_v47, %v448_v41 }
 0x177   : > { %v526_v49 = vsel %vm311_vm0, %v503_v48, 0.0 }
 0x178   : > { %527 = vadd.xlane.f32.xlu2 %v526_v49 }
 0x17c   : > { %v505_v52 = vpop.f32.mrf.mxu2 }
 0x17d   : > { %v506_v53 = vadd.f32 %v505_v52, %v448_v41 }
 0x17f   : > { %v529_v54 = vsel %vm311_vm0, %v506_v53, 0.0 }
 0x180   : > { %530 = vadd.xlane.f32.xlu1 %v529_v54  ;;  %518 = vadd.xlane.f32.xlu2 %v517_v55 }
 0x184   : > { %v508_v56 = vpop.f32.mrf.mxu2 }
 0x185   : > { %v509_v57 = vadd.f32 %v508_v56, %v448_v41 }
 0x187   : > { %v532_v58 = vsel %vm311_vm0, %v509_v57, 0.0 }
 0x188   : > { %533 = vadd.xlane.f32.xlu1 %v532_v58 }
 0x18c   : > { %v511_v60 = vpop.f32.mrf.mxu2 }
 0x18d   : > { %v512_v61 = vadd.f32 %v511_v60, %v448_v41 }
 0x18f   : > { %v535_v63 = vsel %vm311_vm0, %v512_v61, 0.0 }
 0x190   : > { %521 = vadd.xlane.f32.xlu1 %v520_v62  ;;  %536 = vadd.xlane.f32.xlu0 %v535_v63 }
 0x198   : > { %524 = vadd.xlane.f32.xlu0 %v523_v1 }
 0x1c5   : > { %v516_v9 = vpop.xlane.xlu0 %515 }
 0x1c6   : > { %v545_v10 = vmul.f32 %v1894_v8, %v516_v9 }
 0x1c8   : > { %v1897_v11 = vsub.f32 %v491_v43, %v545_v10 }
 0x1ca   : > { %v561_v22 = vmul.f32 %v1897_v11, %v1897_v11 }
 0x1cc   : > { %v569_v23 = vsel %vm311_vm0, %v561_v22, 0.0 }
 0x1cd   : > { %570 = vadd.xlane.f32.xlu2 %v569_v23 }
 0x1eb   : > { %v528_v24 = vpop.xlane.xlu2 %527 }
 0x1ec   : > { %v549_v47 = vmul.f32 %v1894_v8, %v528_v24 }
 0x1f3   : > { %v531_v25 = vpop.xlane.xlu1 %530  ;;  %v519_v34 = vpop.xlane.xlu2 %518 }
 0x1f4   : > { %v550_v30 = vmul.f32 %v1894_v8, %v531_v25  ;;  %v546_v37 = vmul.f32 %v1894_v8, %v519_v34  ;;  %v1961_v34 = vperm.slane %v1883_v40, 2 }
 0x1f6   : > { %v1903_v31 = vsub.f32 %v506_v53, %v550_v30  ;;  %v1914_v43 = vsub.f32 %v494_v51, %v546_v37  ;;  %v1925_v53 = vsub.f32 %v503_v48, %v549_v47 }
 0x1f8   : > { %v566_v32 = vmul.f32 %v1903_v31, %v1903_v31  ;;  %v562_v50 = vmul.f32 %v1914_v43, %v1914_v43 }
 0x1fa   : > { %v584_v33 = vsel %vm311_vm0, %v566_v32, 0.0  ;;  %v572_v51 = vsel %vm311_vm0, %v562_v50, 0.0  ;;  %v1958_v32 = vperm.slane %v1883_v40, 1 }
 0x1fb   : > { %v534_v35 = vpop.xlane.xlu1 %533  ;;  %585 = vadd.xlane.f32.xlu2 %v584_v33 }
 0x1fc   : > { %v551_v36 = vmul.f32 %v1894_v8, %v534_v35 }
 0x1fe   : > { %v1910_v41 = vsub.f32 %v509_v57, %v551_v36 }
 0x200   : > { %v567_v42 = vmul.f32 %v1910_v41, %v1910_v41 }
 0x202   : > { %v587_v44 = vsel %vm311_vm0, %v567_v42, 0.0 }
 0x203   : > { %588 = vadd.xlane.f32.xlu1 %v587_v44  ;;  %v537_v45 = vpop.xlane.xlu0 %536  ;;  %v522_v55 = vpop.xlane.xlu1 %521 }
 0x204   : > { %v552_v46 = vmul.f32 %v1894_v8, %v537_v45  ;;  %v547_v58 = vmul.f32 %v1894_v8, %v522_v55 }
 0x206   : > { %v1919_v49 = vsub.f32 %v512_v61, %v552_v46  ;;  %v565_v61 = vmul.f32 %v1925_v53, %v1925_v53  ;;  %v1937_v62 = vsub.f32 %v497_v59, %v547_v58  ;;  %v725_v59 = vld [vmem:[%s2281_s4 + $0x30] sm:$0xff] }
 0x207   : > { %764 = vmatpush.msra.mxu0 %v725_v59  ;;  %1448 = vmatpush.msra.mxu3 %v725_v59 }
 0x208   : > { %v568_v52 = vmul.f32 %v1919_v49, %v1919_v49  ;;  %v581_v63 = vsel %vm311_vm0, %v565_v61, 0.0  ;;  %v563_v2 = vmul.f32 %v1937_v62, %v1937_v62 }
 0x209   : > { %765 = vmatpush.msra.mxu0 %v724_v4  ;;  %1449 = vmatpush.msra.mxu3 %v724_v4 }
 0x20a   : > { %v590_v54 = vsel %vm311_vm0, %v568_v52, 0.0 }
 0x20b   : > { %573 = vadd.xlane.f32.xlu1 %v572_v51  ;;  %591 = vadd.xlane.f32.xlu0 %v590_v54  ;;  %v525_v56 = vpop.xlane.xlu0 %524 }
 0x20c   : > { %v548_v57 = vmul.f32 %v1894_v8, %v525_v56  ;;  %766 = vmatpush.msra.mxu0 %v723_v5  ;;  %1450 = vmatpush.msra.mxu3 %v723_v5 }
 0x20e   : > { %v1931_v60 = vsub.f32 %v500_v0, %v548_v57  ;;  %v575_v0 = vsel %vm311_vm0, %v563_v2, 0.0 }
 0x210   : > { %v564_v48 = vmul.f32 %v1931_v60, %v1931_v60 }
 0x212   : > { %v578_v1 = vsel %vm311_vm0, %v564_v48, 0.0 }
 0x213   : > { %582 = vadd.xlane.f32.xlu0 %v581_v63  ;;  %579 = vadd.xlane.f32.xlu2 %v578_v1 }
 0x21b   : > { %576 = vadd.xlane.f32.xlu0 %v575_v0 }
 0x240   : > { %v571_v6 = vpop.xlane.xlu2 %570 }
 0x241   : > { %v593_v7 = vmul.f32 %v571_v6, %v1894_v8 }
 0x243   : > { %v601_v9 = vadd.f32 1e-05, %v593_v7 }
 0x245   : > { %1518 = vrsqrt.f32 %v601_v9  ;;  %vm615_vm4 = vweird.f32 %v601_v9 }
 0x24b   : > { %v1519_v10 = vpop.eup %1518 }
 0x24c   : > { %v610_v22 = vmul.f32 %v1519_v10, %v601_v9  ;;  %vm616_vm3 = vweird.f32 %v1519_v10 }
 0x24d   : > { %vm617_vm5 = vmor %vm615_vm4, %vm616_vm3 }
 0x24e   : > { %v611_v23 = vmul.f32 %v1519_v10, %v610_v22 }
 0x250   : > { %v612_v24 = vmul.f32 0.5, %v611_v23 }
 0x252   : > { %v613_v25 = vsub.f32 1.5, %v612_v24 }
 0x254   : > { %v614_v30 = vmul.f32 %v1519_v10, %v613_v25 }
 0x256   : > { %v618_v33 = vsel %vm617_vm5, %v1519_v10, %v614_v30 }
 0x257   : > { %v689_v35 = vmul.f32 %v618_v33, %v1897_v11 }
 0x259   : > { %v698_v36 = vmul.f32 %v1958_v32, %v689_v35 }
 0x25b   : > { %v1966_v37 = vadd.f32 %v1961_v34, %v698_v36 }
 0x25d   : > { %v715_v42 = vmax.f32 %v1966_v37, 0.0 }
 0x25f   : > { %1401 = vmatmul.msk.f32.vlgmr.msra.gmra.mxu0 %vm311_vm0, %v715_v42 }
 0x26e   : > { %v586_v44 = vpop.xlane.xlu2 %585 }
 0x26f   : > { %v598_v45 = vmul.f32 %v586_v44, %v1894_v8 }
 0x271   : > { %v606_v46 = vadd.f32 1e-05, %v598_v45 }
 0x273   : > { %1520 = vrsqrt.f32 %v606_v46  ;;  %vm665_vm10 = vweird.f32 %v606_v46 }
 0x276   : > { %v589_v40 = vpop.xlane.xlu1 %588 }
 0x277   : > { %v599_v47 = vmul.f32 %v589_v40, %v1894_v8 }
 0x279   : > { %v607_v11 = vadd.f32 1e-05, %v599_v47  ;;  %v1974_v50 = vpop.eup %1520 }
 0x27a   : > { %v660_v52 = vmul.f32 %v1974_v50, %v606_v46  ;;  %vm666_vm7 = vweird.f32 %v1974_v50 }
 0x27b   : > { %1522 = vrsqrt.f32 %v607_v11  ;;  %vm675_vm8 = vweird.f32 %v607_v11  ;;  %vm1997_vm11 = vmor %vm665_vm10, %vm666_vm7 }
 0x27c   : > { %v661_v58 = vmul.f32 %v1974_v50, %v660_v52 }
 0x27e   : > { %v574_v51 = vpop.xlane.xlu1 %573  ;;  %v592_v54 = vpop.xlane.xlu0 %591  ;;  %v662_v2 = vmul.f32 0.5, %v661_v58 }
 0x27f   : > { %v594_v55 = vmul.f32 %v574_v51, %v1894_v8  ;;  %v600_v56 = vmul.f32 %v592_v54, %v1894_v8 }
 0x280   : > { %v663_v9 = vsub.f32 1.5, %v662_v2 }
 0x281   : > { %v1523_v57 = vpop.eup %1522  ;;  %v602_v61 = vadd.f32 1e-05, %v594_v55  ;;  %v608_v48 = vadd.f32 1e-05, %v600_v56 }
 0x282   : > { %v670_v63 = vmul.f32 %v1523_v57, %v607_v11  ;;  %vm676_vm6 = vweird.f32 %v1523_v57  ;;  %v664_v35 = vmul.f32 %v1974_v50, %v663_v9 }
 0x283   : > { %1524 = vrsqrt.f32 %v602_v61  ;;  %vm1990_vm9 = vmor %vm675_vm8, %vm676_vm6  ;;  %vm625_vm14 = vweird.f32 %v602_v61  ;;  %vm685_vm2 = vweird.f32 %v608_v48 }
 0x284   : > { %v671_v1 = vmul.f32 %v1523_v57, %v670_v63  ;;  %1526 = vrsqrt.f32 %v608_v48  ;;  %v668_v56 = vsel %vm1997_vm11, %v1974_v50, %v664_v35 }
 0x286   : > { %v672_v0 = vmul.f32 0.5, %v671_v1  ;;  %v580_v3 = vpop.xlane.xlu2 %579  ;;  %v583_v59 = vpop.xlane.xlu0 %582 }
 0x287   : > { %v596_v4 = vmul.f32 %v580_v3, %v1894_v8  ;;  %v597_v5 = vmul.f32 %v583_v59, %v1894_v8 }
 0x288   : > { %v673_v6 = vsub.f32 1.5, %v672_v0 }
 0x289   : > { %v1525_v7 = vpop.eup %1524  ;;  %v1982_v10 = vadd.f32 1e-05, %v596_v4  ;;  %v1984_v22 = vadd.f32 1e-05, %v597_v5  ;;  %v694_v4 = vmul.f32 %v668_v56, %v1903_v31 }
 0x28a   : > { %v1527_v23 = vpop.eup %1526  ;;  %v620_v24 = vmul.f32 %v1525_v7, %v602_v61  ;;  %v674_v25 = vmul.f32 %v1523_v57, %v673_v6  ;;  %vm626_vm12 = vweird.f32 %v1525_v7 }
 0x28b   : > { %v680_v30 = vmul.f32 %v1527_v23, %v608_v48  ;;  %1528 = vrsqrt.f32 %v1982_v10  ;;  %vm686_vm13 = vweird.f32 %v1527_v23  ;;  %vm627_vm15 = vmor %vm625_vm14, %vm626_vm12  ;;  %vm645_vm5 = vweird.f32 %v1982_v10 }
 0x28c   : > { %v621_v33 = vmul.f32 %v1525_v7, %v620_v24  ;;  %1530 = vrsqrt.f32 %v1984_v22  ;;  %v678_v47 = vsel %vm1990_vm9, %v1523_v57, %v674_v25  ;;  %vm687_vm3 = vmor %vm685_vm2, %vm686_vm13  ;;  %vm655_vm8 = vweird.f32 %v1984_v22 }
 0x28d   : > { %v681_v36 = vmul.f32 %v1527_v23, %v680_v30  ;;  %v695_v2 = vmul.f32 %v678_v47, %v1910_v41 }
 0x28e   : > { %v622_v45 = vmul.f32 0.5, %v621_v33  ;;  %v577_v40 = vpop.xlane.xlu0 %576  ;;  %v703_v33 = vmul.f32 %v1958_v32, %v694_v4 }
 0x28f   : > { %v682_v52 = vmul.f32 0.5, %v681_v36  ;;  %v595_v51 = vmul.f32 %v577_v40, %v1894_v8  ;;  %v704_v41 = vmul.f32 %v1958_v32, %v695_v2 }
 0x290   : > { %v623_v55 = vsub.f32 1.5, %v622_v45 }
 0x291   : > { %v1529_v11 = vpop.eup %1528  ;;  %v683_v58 = vsub.f32 1.5, %v682_v52  ;;  %v2004_v46 = vadd.f32 1e-05, %v595_v51  ;;  %v713_v44 = vadd.f32 %v1961_v34, %v704_v41  ;;  %v712_v51 = vadd.f32 %v1961_v34, %v703_v33 }
 0x292   : > { %v1531_v63 = vpop.eup %1530  ;;  %v624_v57 = vmul.f32 %v1525_v7, %v623_v55  ;;  %v640_v1 = vmul.f32 %v1529_v11, %v1982_v10  ;;  %vm646_vm4 = vweird.f32 %v1529_v11 }
 0x293   : > { %v684_v0 = vmul.f32 %v1527_v23, %v683_v58  ;;  %v650_v3 = vmul.f32 %v1531_v63, %v1984_v22  ;;  %1532 = vrsqrt.f32 %v2004_v46  ;;  %vm656_vm6 = vweird.f32 %v1531_v63  ;;  %vm647_vm7 = vmor %vm645_vm5, %vm646_vm4 }
 0x294   : > { %v628_v59 = vsel %vm627_vm15, %v1525_v7, %v624_v57  ;;  %v641_v50 = vmul.f32 %v1529_v11, %v640_v1  ;;  %vm657_vm9 = vmor %vm655_vm8, %vm656_vm6  ;;  %v721_v58 = vmax.f32 %v713_v44, 0.0  ;;  %vm635_vm11 = vweird.f32 %v2004_v46 }
 0x295   : > { %v688_v5 = vsel %vm687_vm3, %v1527_v23, %v684_v0  ;;  %v651_v6 = vmul.f32 %v1531_v63, %v650_v3  ;;  %v690_v61 = vmul.f32 %v628_v59, %v1914_v43 }
 0x296   : > { %v696_v9 = vmul.f32 %v688_v5, %v1919_v49  ;;  %v642_v24 = vmul.f32 0.5, %v641_v50 }
 0x297   : > { %v652_v25 = vmul.f32 0.5, %v651_v6  ;;  %v699_v48 = vmul.f32 %v1958_v32, %v690_v61 }
 0x298   : > { %v643_v30 = vsub.f32 1.5, %v642_v24  ;;  %v705_v7 = vmul.f32 %v1958_v32, %v696_v9 }
 0x299   : > { %v1533_v35 = vpop.eup %1532  ;;  %v653_v31 = vsub.f32 1.5, %v652_v25  ;;  %v708_v43 = vadd.f32 %v1961_v34, %v699_v48 }
 0x29a   : > { %v644_v49 = vmul.f32 %v1529_v11, %v643_v30  ;;  %v630_v23 = vmul.f32 %v1533_v35, %v2004_v46  ;;  %v714_v36 = vadd.f32 %v1961_v34, %v705_v7  ;;  %vm636_vm10 = vweird.f32 %v1533_v35 }
 0x29b   : > { %v654_v45 = vmul.f32 %v1531_v63, %v653_v31  ;;  %v716_v40 = vmax.f32 %v708_v43, 0.0  ;;  %vm637_vm12 = vmor %vm635_vm11, %vm636_vm10 }
 0x29c   : > { %v648_v47 = vsel %vm647_vm7, %v1529_v11, %v644_v49  ;;  %v631_v52 = vmul.f32 %v1533_v35, %v630_v23  ;;  %v722_v10 = vmax.f32 %v714_v36, 0.0  ;;  %v720_v11 = vmax.f32 %v712_v51, 0.0  ;;  %v2104_v36 = vld [vmem:[%s2280_s3 + $0x4] sm:$0x7] }
 0x29d   : > { %v658_v54 = vsel %vm657_vm9, %v1531_v63, %v654_v45  ;;  %1402 = vmatmul.msk.f32.gmra.mxu0 %vm311_vm0, %v716_v40  ;;  %v692_v55 = vmul.f32 %v648_v47, %v1931_v60 }
 0x29e   : > { %v632_v56 = vmul.f32 0.5, %v631_v52  ;;  %810 = vmatpush.msrb.mxu0 %v722_v10  ;;  %v693_v57 = vmul.f32 %v658_v54, %v1925_v53 }
 0x29f   : > { %v701_v1 = vmul.f32 %v1958_v32, %v692_v55 }
 0x2a0   : > { %v633_v22 = vsub.f32 1.5, %v632_v56  ;;  %811 = vmatpush.msrb.mxu0 %v721_v58  ;;  %v702_v2 = vmul.f32 %v1958_v32, %v693_v57 }
 0x2a1   : > { %v710_v60 = vadd.f32 %v1961_v34, %v701_v1 }
 0x2a2   : > { %v634_v0 = vmul.f32 %v1533_v35, %v633_v22  ;;  %812 = vmatpush.msrb.mxu0 %v720_v11  ;;  %v711_v63 = vadd.f32 %v1961_v34, %v702_v2 }
 0x2a3   : > { %v718_v50 = vmax.f32 %v710_v60, 0.0 }
 0x2a4   : > { %v638_v3 = vsel %vm637_vm12, %v1533_v35, %v634_v0  ;;  %v719_v59 = vmax.f32 %v711_v63, 0.0 }
 0x2a5   : > { %v691_v53 = vmul.f32 %v638_v3, %v1937_v62  ;;  %v847_v62 = vld [vmem:[#allocation5 + $0x38] sm:$0xff] }
 0x2a6   : > { %813 = vmatpush.msrb.mxu0 %v719_v59  ;;  %885 = vmatpush.msrb.mxu2 %v847_v62 }
 0x2a7   : > { %v700_v4 = vmul.f32 %v1958_v32, %v691_v53  ;;  %v846_v32 = vld [vmem:[#allocation5 + $0x30] sm:$0xff] }
 0x2a8   : > { %814 = vmatpush.msrb.mxu0 %v718_v50  ;;  %886 = vmatpush.msrb.mxu2 %v846_v32 }
 0x2a9   : > { %v709_v5 = vadd.f32 %v1961_v34, %v700_v4  ;;  %v845_v34 = vld [vmem:[#allocation5 + $0x28] sm:$0xff] }
 0x2aa   : > { %887 = vmatpush.msrb.mxu2 %v845_v34 }
 0x2ab   : > { %v717_v6 = vmax.f32 %v709_v5, 0.0 }
 0x2ad   : > { %1403 = vmatmul.msk.f32.vlgmr.msra.gmra.mxu3 %vm311_vm0, %v717_v6  ;;  %815 = vmatpush.msrb.mxu0 %v717_v6 }
 0x2af   : > { %816 = vmatpush.msrb.mxu0 %v716_v40 }
 0x2b1   : > { %817 = vmatpush.msrb.mxu0 %v715_v42 }
 0x2b2   : > { %1410 = vmatmul.msk.f32.vlgmr.msrb.gmra.mxu0 %vm378_vm1, %v1824_v12  ;;  %v2056_v12 = vld [vmem:[%s2282_s5] sm:$0x7] }
 0x2b5   : > { %1404 = vmatmul.msk.f32.gmra.mxu3 %vm311_vm0, %v718_v50 }
 0x2ba   : > { %1411 = vmatmul.msk.f32.gmra.mxu0 %vm378_vm1, %v1828_v13  ;;  %v2059_v13 = vperm.slane %v2056_v12, 0 }
 0x2bc   : > { %v360_v46 = vadd.f32 %v1856_v20, %v2059_v13  ;;  %v363_v9 = vadd.f32 %v1858_v21, %v2059_v13  ;;  %v366_v41 = vadd.f32 %v1860_v26, %v2059_v13  ;;  %v369_v30 = vadd.f32 %v1862_v27, %v2059_v13 }
 0x2bd   : > { %1405 = vmatmul.msk.f32.gmra.mxu3 %vm311_vm0, %v719_v59  ;;  %v372_v35 = vadd.f32 %v1864_v28, %v2059_v13  ;;  %v848_v28 = vperm.slane %v2104_v36, 0 }
 0x2c2   : > { %1412 = vmatmul.msk.f32.gmra.mxu0 %vm378_vm1, %v1832_v14  ;;  %v354_v14 = vadd.f32 %v1876_v38, %v2059_v13 }
 0x2c5   : > { %1406 = vmatmul.msk.f32.gmra.mxu3 %vm311_vm0, %v720_v11 }
 0x2ca   : > { %1413 = vmatmul.msk.f32.gmra.mxu0 %vm378_vm1, %v1836_v15 }
 0x2cd   : > { %1407 = vmatmul.msk.f32.gmra.mxu3 %vm311_vm0, %v721_v58 }
 0x2d2   : > { %1414 = vmatmul.msk.f32.gmra.mxu0 %vm378_vm1, %v1840_v16  ;;  %v844_v16 = vld [vmem:[#allocation5 + $0x20] sm:$0xff] }
 0x2d3   : > { %888 = vmatpush.msrb.mxu2 %v844_v16 }
 0x2d5   : > { %1408 = vmatmul.msk.f32.gmra.mxu3 %vm311_vm0, %v722_v10 }
 0x2da   : > { %1415 = vmatmul.msk.f32.gmra.mxu0 %vm378_vm1, %v1844_v17 }
 0x2dc   : > { %v768_v15 = vpop.f32.mrf.mxu0 }
 0x2dd   : > { %v2065_v37 = vadd.f32 %v768_v15, %v354_v14 }
 0x2e2   : > { %1416 = vmatmul.msk.f32.gmra.mxu0 %vm378_vm1, %v1848_v18 }
 0x2ea   : > { %1417 = vmatmul.msk.f32.gmra.mxu0 %vm378_vm1, %v1852_v19 }
 0x31a   : > { %v2071_v42 = vpop.f32.mrf.mxu0 }
 0x32f   : > { %v819_v17 = vpop.f32.mrf.mxu0 }
 0x330   : > { %v774_v61 = vpop.f32.mrf.mxu3  ;;  %1418 = vmatmul.msk.f32.vlgmr.msrb.gmra.mxu2 %vm311_vm0, %v819_v17 }
 0x331   : > { %v2076_v38 = vadd.f32 %v774_v61, %v360_v46 }
 0x337   : > { %v822_v18 = vpop.f32.mrf.mxu0 }
 0x338   : > { %v777_v24 = vpop.f32.mrf.mxu3  ;;  %1419 = vmatmul.msk.f32.gmra.mxu2 %vm311_vm0, %v822_v18 }
 0x339   : > { %v2081_v19 = vadd.f32 %v777_v24, %v363_v9 }
 0x33f   : > { %v825_v25 = vpop.f32.mrf.mxu0 }
 0x340   : > { %v780_v20 = vpop.f32.mrf.mxu3  ;;  %1420 = vmatmul.msk.f32.gmra.mxu2 %vm311_vm0, %v825_v25 }
 0x341   : > { %v2086_v48 = vadd.f32 %v780_v20, %v366_v41 }
 0x347   : > { %v828_v7 = vpop.f32.mrf.mxu0 }
 0x348   : > { %v783_v21 = vpop.f32.mrf.mxu3  ;;  %1421 = vmatmul.msk.f32.gmra.mxu2 %vm311_vm0, %v828_v7 }
 0x349   : > { %v2091_v33 = vadd.f32 %v783_v21, %v369_v30 }
 0x34f   : > { %v831_v31 = vpop.f32.mrf.mxu0 }
 0x350   : > { %v786_v26 = vpop.f32.mrf.mxu3  ;;  %1422 = vmatmul.msk.f32.gmra.mxu2 %vm311_vm0, %v831_v31 }
 0x351   : > { %v2096_v43 = vadd.f32 %v786_v26, %v372_v35 }
 0x357   : > { %v834_v49 = vpop.f32.mrf.mxu0 }
 0x358   : > { %1423 = vmatmul.msk.f32.gmra.mxu2 %vm311_vm0, %v834_v49 }
 0x35f   : > { %v837_v23 = vpop.f32.mrf.mxu0 }
 0x360   : > { %1424 = vmatmul.msk.f32.gmra.mxu2 %vm311_vm0, %v837_v23 }
 0x367   : > { %v840_v27 = vpop.f32.mrf.mxu0 }
 0x368   : > { %1425 = vmatmul.msk.f32.gmra.mxu2 %vm311_vm0, %v840_v27 }
 0x3b3   : > { %v890_v44 = vpop.f32.mrf.mxu2 }
 0x3b4   : > { %v891_v45 = vadd.f32 %v890_v44, %v848_v28 }
 0x3b6   : > { %v914_v40 = vsel %vm311_vm0, %v891_v45, 0.0 }
 0x3b7   : > { %915 = vadd.xlane.f32.xlu1 %v914_v40 }
 0x3bb   : > { %v893_v47 = vpop.f32.mrf.mxu2 }
 0x3bc   : > { %v894_v52 = vadd.f32 %v893_v47, %v848_v28 }
 0x3be   : > { %v917_v10 = vsel %vm311_vm0, %v894_v52, 0.0 }
 0x3bf   : > { %918 = vadd.xlane.f32.xlu2 %v917_v10 }
 0x3c3   : > { %v896_v51 = vpop.f32.mrf.mxu2 }
 0x3c4   : > { %v897_v54 = vadd.f32 %v896_v51, %v848_v28 }
 0x3c6   : > { %v920_v55 = vsel %vm311_vm0, %v897_v54, 0.0 }
 0x3c7   : > { %921 = vadd.xlane.f32.xlu0 %v920_v55  ;;  %v1119_v55 = vld [vmem:[%s2281_s4 + $0x58] sm:$0xff] }
 0x3c8   : > { %1156 = vmatpush.msrb.mxu3 %v1119_v55 }
 0x3cb   : > { %v899_v56 = vpop.f32.mrf.mxu2 }
 0x3cc   : > { %v900_v58 = vadd.f32 %v899_v56, %v848_v28  ;;  %v1118_v56 = vld [vmem:[%s2281_s4 + $0x50] sm:$0xff] }
 0x3cd   : > { %1157 = vmatpush.msrb.mxu3 %v1118_v56 }
 0x3ce   : > { %v923_v57 = vsel %vm311_vm0, %v900_v58, 0.0 }
 0x3cf   : > { %924 = vadd.xlane.f32.xlu1 %v923_v57  ;;  %v1116_v57 = vld [vmem:[%s2281_s4 + $0x40] sm:$0xff] }
 0x3d3   : > { %v902_v1 = vpop.f32.mrf.mxu2 }
 0x3d4   : > { %v903_v22 = vadd.f32 %v902_v1, %v848_v28 }
 0x3d6   : > { %v926_v11 = vsel %vm311_vm0, %v903_v22, 0.0 }
 0x3d7   : > { %927 = vadd.xlane.f32.xlu2 %v926_v11 }
 0x3db   : > { %v905_v2 = vpop.f32.mrf.mxu2 }
 0x3dc   : > { %v906_v0 = vadd.f32 %v905_v2, %v848_v28 }
 0x3de   : > { %v929_v63 = vsel %vm311_vm0, %v906_v0, 0.0 }
 0x3df   : > { %930 = vadd.xlane.f32.xlu0 %v929_v63 }
 0x3e3   : > { %v908_v60 = vpop.f32.mrf.mxu2 }
 0x3e4   : > { %v909_v3 = vadd.f32 %v908_v60, %v848_v28 }
 0x3e6   : > { %v932_v59 = vsel %vm311_vm0, %v909_v3, 0.0 }
 0x3e7   : > { %933 = vadd.xlane.f32.xlu2 %v932_v59 }
 0x3eb   : > { %v911_v6 = vpop.f32.mrf.mxu2 }
 0x3ec   : > { %v912_v14 = vadd.f32 %v911_v6, %v848_v28 }
 0x3ee   : > { %v935_v46 = vsel %vm311_vm0, %v912_v14, 0.0 }
 0x42a   : > { %v916_v53 = vpop.xlane.xlu1 %915 }
 0x42b   : > { %v938_v50 = vmul.f32 %v916_v53, %v1894_v8 }
 0x42d   : > { %v2115_v4 = vsub.f32 %v891_v45, %v938_v50 }
 0x42f   : > { %v954_v5 = vmul.f32 %v2115_v4, %v2115_v4 }
 0x431   : > { %v962_v62 = vsel %vm311_vm0, %v954_v5, 0.0 }
 0x432   : > { %v919_v32 = vpop.xlane.xlu2 %918  ;;  %963 = vadd.xlane.f32.xlu1 %v962_v62 }
 0x433   : > { %v939_v34 = vmul.f32 %v919_v32, %v1894_v8 }
 0x435   : > { %v2121_v15 = vsub.f32 %v894_v52, %v939_v34 }
 0x437   : > { %v955_v16 = vmul.f32 %v2121_v15, %v2121_v15 }
 0x439   : > { %v965_v17 = vsel %vm311_vm0, %v955_v16, 0.0 }
 0x43a   : > { %v922_v61 = vpop.xlane.xlu0 %921  ;;  %966 = vadd.xlane.f32.xlu0 %v965_v17  ;;  %936 = vadd.xlane.f32.xlu1 %v935_v46 }
 0x43b   : > { %v940_v9 = vmul.f32 %v922_v61, %v1894_v8 }
 0x43d   : > { %v2128_v18 = vsub.f32 %v897_v54, %v940_v9 }
 0x43f   : > { %v956_v24 = vmul.f32 %v2128_v18, %v2128_v18 }
 0x441   : > { %v968_v41 = vsel %vm311_vm0, %v956_v24, 0.0  ;;  %v2179_v24 = vperm.slane %v2104_v36, 1 }
 0x442   : > { %v925_v25 = vpop.xlane.xlu1 %924  ;;  %969 = vadd.xlane.f32.xlu2 %v968_v41 }
 0x443   : > { %v941_v20 = vmul.f32 %v925_v25, %v1894_v8 }
 0x445   : > { %v2134_v30 = vsub.f32 %v900_v58, %v941_v20  ;;  %v1117_v58 = vld [vmem:[%s2281_s4 + $0x48] sm:$0xff]  ;;  %v2182_v20 = vperm.slane %v2104_v36, 2 }
 0x446   : > { %1158 = vmatpush.msrb.mxu3 %v1117_v58 }
 0x447   : > { %v957_v7 = vmul.f32 %v2134_v30, %v2134_v30 }
 0x448   : > { %1159 = vmatpush.msrb.mxu3 %v1116_v57 }
 0x449   : > { %v971_v21 = vsel %vm311_vm0, %v957_v7, 0.0 }
 0x44a   : > { %v928_v35 = vpop.xlane.xlu2 %927  ;;  %972 = vadd.xlane.f32.xlu0 %v971_v21 }
 0x44b   : > { %v942_v31 = vmul.f32 %v928_v35, %v1894_v8 }
 0x44d   : > { %v2140_v26 = vsub.f32 %v903_v22, %v942_v31 }
 0x44f   : > { %v958_v49 = vmul.f32 %v2140_v26, %v2140_v26 }
 0x451   : > { %v974_v23 = vsel %vm311_vm0, %v958_v49, 0.0 }
 0x452   : > { %v931_v27 = vpop.xlane.xlu0 %930  ;;  %975 = vadd.xlane.f32.xlu1 %v974_v23 }
 0x453   : > { %v943_v28 = vmul.f32 %v931_v27, %v1894_v8 }
 0x455   : > { %v2146_v44 = vsub.f32 %v906_v0, %v943_v28 }
 0x457   : > { %v959_v45 = vmul.f32 %v2146_v44, %v2146_v44 }
 0x459   : > { %v977_v40 = vsel %vm311_vm0, %v959_v45, 0.0 }
 0x45a   : > { %978 = vadd.xlane.f32.xlu2 %v977_v40  ;;  %v934_v47 = vpop.xlane.xlu2 %933 }
 0x45b   : > { %v944_v52 = vmul.f32 %v934_v47, %v1894_v8 }
 0x45d   : > { %v2152_v10 = vsub.f32 %v909_v3, %v944_v52 }
 0x45f   : > { %v960_v51 = vmul.f32 %v2152_v10, %v2152_v10 }
 0x461   : > { %v980_v54 = vsel %vm311_vm0, %v960_v51, 0.0 }
 0x462   : > { %981 = vadd.xlane.f32.xlu0 %v980_v54 }
 0x4a5   : > { %v964_v1 = vpop.xlane.xlu1 %963 }
 0x4a6   : > { %v986_v22 = vmul.f32 %v964_v1, %v1894_v8 }
 0x4a8   : > { %v994_v11 = vadd.f32 1e-05, %v986_v22 }
 0x4aa   : > { %1534 = vrsqrt.f32 %v994_v11  ;;  %vm1008_vm14 = vweird.f32 %v994_v11 }
 0x4ad   : > { %v967_v2 = vpop.xlane.xlu0 %966  ;;  %v937_v0 = vpop.xlane.xlu1 %936 }
 0x4ae   : > { %v987_v63 = vmul.f32 %v967_v2, %v1894_v8  ;;  %v945_v60 = vmul.f32 %v937_v0, %v1894_v8 }
 0x4b0   : > { %v1535_v3 = vpop.eup %1534  ;;  %v995_v59 = vadd.f32 1e-05, %v987_v63  ;;  %v2172_v53 = vsub.f32 %v912_v14, %v945_v60 }
 0x4b1   : > { %v1003_v50 = vmul.f32 %v1535_v3, %v994_v11  ;;  %vm1009_vm13 = vweird.f32 %v1535_v3 }
 0x4b2   : > { %1536 = vrsqrt.f32 %v995_v59  ;;  %v961_v5 = vmul.f32 %v2172_v53, %v2172_v53  ;;  %vm1010_vm15 = vmor %vm1008_vm14, %vm1009_vm13  ;;  %vm1018_vm3 = vweird.f32 %v995_v59 }
 0x4b3   : > { %v1004_v6 = vmul.f32 %v1535_v3, %v1003_v50 }
 0x4b4   : > { %v983_v62 = vsel %vm311_vm0, %v961_v5, 0.0 }
 0x4b5   : > { %v1005_v32 = vmul.f32 0.5, %v1004_v6  ;;  %v970_v34 = vpop.xlane.xlu2 %969  ;;  %984 = vadd.xlane.f32.xlu1 %v983_v62 }
 0x4b6   : > { %v988_v16 = vmul.f32 %v970_v34, %v1894_v8 }
 0x4b7   : > { %v1006_v46 = vsub.f32 1.5, %v1005_v32 }
 0x4b8   : > { %v1537_v17 = vpop.eup %1536  ;;  %v996_v61 = vadd.f32 1e-05, %v988_v16 }
 0x4b9   : > { %v1007_v9 = vmul.f32 %v1535_v3, %v1006_v46  ;;  %v1013_v14 = vmul.f32 %v1537_v17, %v995_v59  ;;  %vm1019_vm2 = vweird.f32 %v1537_v17 }
 0x4ba   : > { %1538 = vrsqrt.f32 %v996_v61  ;;  %vm1020_vm4 = vmor %vm1018_vm3, %vm1019_vm2  ;;  %vm1028_vm6 = vweird.f32 %v996_v61 }
 0x4bb   : > { %v1011_v41 = vsel %vm1010_vm15, %v1535_v3, %v1007_v9  ;;  %v1014_v25 = vmul.f32 %v1537_v17, %v1013_v14 }
 0x4bc   : > { %v1082_v7 = vmul.f32 %v1011_v41, %v2115_v4 }
 0x4bd   : > { %v1015_v21 = vmul.f32 0.5, %v1014_v25  ;;  %v973_v35 = vpop.xlane.xlu0 %972 }
 0x4be   : > { %v989_v31 = vmul.f32 %v973_v35, %v1894_v8  ;;  %v1091_v49 = vmul.f32 %v2179_v24, %v1082_v7 }
 0x4bf   : > { %v1016_v23 = vsub.f32 1.5, %v1015_v21 }
 0x4c0   : > { %v1539_v27 = vpop.eup %1538  ;;  %v997_v28 = vadd.f32 1e-05, %v989_v31  ;;  %v1100_v45 = vadd.f32 %v2182_v20, %v1091_v49 }
 0x4c1   : > { %v1017_v40 = vmul.f32 %v1537_v17, %v1016_v23  ;;  %v1023_v47 = vmul.f32 %v1539_v27, %v996_v61  ;;  %vm1029_vm5 = vweird.f32 %v1539_v27 }
 0x4c2   : > { %1540 = vrsqrt.f32 %v997_v28  ;;  %v1108_v36 = vmax.f32 %v1100_v45, 0.0  ;;  %vm1030_vm7 = vmor %vm1028_vm6, %vm1029_vm5  ;;  %vm1038_vm9 = vweird.f32 %v997_v28 }
 0x4c3   : > { %v1021_v52 = vsel %vm1020_vm4, %v1537_v17, %v1017_v40  ;;  %v1024_v4 = vmul.f32 %v1539_v27, %v1023_v47 }
 0x4c4   : > { %1426 = vmatmul.msk.f32.vlgmr.msrb.gmra.mxu3 %vm311_vm0, %v1108_v36  ;;  %v1083_v51 = vmul.f32 %v1021_v52, %v2121_v15 }
 0x4c5   : > { %v1025_v54 = vmul.f32 0.5, %v1024_v4  ;;  %v976_v55 = vpop.xlane.xlu1 %975 }
 0x4c6   : > { %v990_v56 = vmul.f32 %v976_v55, %v1894_v8  ;;  %v1092_v58 = vmul.f32 %v2179_v24, %v1083_v51 }
 0x4c7   : > { %v1026_v57 = vsub.f32 1.5, %v1025_v54 }
 0x4c8   : > { %v1541_v1 = vpop.eup %1540  ;;  %v998_v22 = vadd.f32 1e-05, %v990_v56  ;;  %v1101_v11 = vadd.f32 %v2182_v20, %v1092_v58 }
 0x4c9   : > { %v1027_v2 = vmul.f32 %v1539_v27, %v1026_v57  ;;  %v1033_v0 = vmul.f32 %v1541_v1, %v997_v28  ;;  %vm1039_vm8 = vweird.f32 %v1541_v1 }
 0x4ca   : > { %1542 = vrsqrt.f32 %v998_v22  ;;  %v1109_v63 = vmax.f32 %v1101_v11, 0.0  ;;  %vm1040_vm10 = vmor %vm1038_vm9, %vm1039_vm8  ;;  %vm1048_vm12 = vweird.f32 %v998_v22  ;;  %vm1250_vm9 = vcmask 1042434  }
 0x4cb   : > { %v1031_v60 = vsel %vm1030_vm7, %v1539_v27, %v1027_v2  ;;  %v1034_v15 = vmul.f32 %v1541_v1, %v1033_v0 }
 0x4cc   : > { %1427 = vmatmul.msk.f32.gmra.mxu3 %vm311_vm0, %v1109_v63  ;;  %v1084_v3 = vmul.f32 %v1031_v60, %v2128_v18 }
 0x4cd   : > { %v1035_v59 = vmul.f32 0.5, %v1034_v15  ;;  %v979_v50 = vpop.xlane.xlu2 %978 }
 0x4ce   : > { %v991_v5 = vmul.f32 %v979_v50, %v1894_v8  ;;  %v1093_v6 = vmul.f32 %v2179_v24, %v1084_v3 }
 0x4cf   : > { %v1036_v62 = vsub.f32 1.5, %v1035_v59 }
 0x4d0   : > { %v1543_v32 = vpop.eup %1542  ;;  %v999_v34 = vadd.f32 1e-05, %v991_v5  ;;  %v1102_v16 = vadd.f32 %v2182_v20, %v1093_v6 }
 0x4d1   : > { %v1037_v46 = vmul.f32 %v1541_v1, %v1036_v62  ;;  %v1043_v17 = vmul.f32 %v1543_v32, %v998_v22  ;;  %vm1049_vm11 = vweird.f32 %v1543_v32 }
 0x4d2   : > { %1544 = vrsqrt.f32 %v999_v34  ;;  %v1110_v61 = vmax.f32 %v1102_v16, 0.0  ;;  %vm1050_vm13 = vmor %vm1048_vm12, %vm1049_vm11  ;;  %vm1058_vm15 = vweird.f32 %v999_v34  ;;  %vm1256_vm11 = vcmask 519168  }
 0x4d3   : > { %v1041_v9 = vsel %vm1040_vm10, %v1541_v1, %v1037_v46  ;;  %v1044_v18 = vmul.f32 %v1543_v32, %v1043_v17  ;;  %vm1253_vm10 = vcmask 1043459  }
 0x4d4   : > { %1428 = vmatmul.msk.f32.gmra.mxu3 %vm311_vm0, %v1110_v61  ;;  %v1085_v14 = vmul.f32 %v1041_v9, %v2134_v30  ;;  %v2217_v9 = vpop.f32.mrf.mxu3 }
 0x4d5   : > { %v1045_v41 = vmul.f32 0.5, %v1044_v18  ;;  %v982_v25 = vpop.xlane.xlu0 %981 }
 0x4d6   : > { %v992_v7 = vmul.f32 %v982_v25, %v1894_v8  ;;  %v1094_v21 = vmul.f32 %v2179_v24, %v1085_v14 }
 0x4d7   : > { %v1046_v35 = vsub.f32 1.5, %v1045_v41 }
 0x4d8   : > { %v1545_v31 = vpop.eup %1544  ;;  %v1000_v49 = vadd.f32 1e-05, %v992_v7  ;;  %v1103_v23 = vadd.f32 %v2182_v20, %v1094_v21  ;;  %v357_v7 = vadd.f32 %v1878_v39, %v2059_v13 }
 0x4d9   : > { %v1047_v27 = vmul.f32 %v1543_v32, %v1046_v35  ;;  %v1053_v28 = vmul.f32 %v1545_v31, %v999_v34  ;;  %vm1059_vm14 = vweird.f32 %v1545_v31 }
 0x4da   : > { %1546 = vrsqrt.f32 %v1000_v49  ;;  %v1111_v45 = vmax.f32 %v1103_v23, 0.0  ;;  %vm1060_vm2 = vmor %vm1058_vm15, %vm1059_vm14  ;;  %vm1068_vm4 = vweird.f32 %v1000_v49  ;;  %v793_v35 = vadd.f32 %v2071_v42, %v357_v7 }
 0x4db   : > { %v1051_v40 = vsel %vm1050_vm13, %v1543_v32, %v1047_v27  ;;  %v1054_v30 = vmul.f32 %v1545_v31, %v1053_v28 }
 0x4dc   : > { %1429 = vmatmul.msk.f32.gmra.mxu3 %vm311_vm0, %v1111_v45  ;;  %v1086_v47 = vmul.f32 %v1051_v40, %v2140_v26 }
 0x4dd   : > { %v1055_v36 = vmul.f32 0.5, %v1054_v30 }
 0x4de   : > { %v1095_v52 = vmul.f32 %v2179_v24, %v1086_v47 }
 0x4df   : > { %v1056_v4 = vsub.f32 1.5, %v1055_v36 }
 0x4e0   : > { %v1547_v51 = vpop.eup %1546  ;;  %v1104_v54 = vadd.f32 %v2182_v20, %v1095_v52 }
 0x4e1   : > { %v1057_v55 = vmul.f32 %v1545_v31, %v1056_v4  ;;  %v1063_v56 = vmul.f32 %v1547_v51, %v1000_v49  ;;  %vm1069_vm3 = vweird.f32 %v1547_v51 }
 0x4e2   : > { %v1112_v58 = vmax.f32 %v1104_v54, 0.0  ;;  %vm1070_vm5 = vmor %vm1068_vm4, %vm1069_vm3 }
 0x4e3   : > { %v1061_v57 = vsel %vm1060_vm2, %v1545_v31, %v1057_v55  ;;  %v1064_v1 = vmul.f32 %v1547_v51, %v1063_v56 }
 0x4e4   : > { %1430 = vmatmul.msk.f32.gmra.mxu3 %vm311_vm0, %v1112_v58  ;;  %v1087_v22 = vmul.f32 %v1061_v57, %v2146_v44 }
 0x4e5   : > { %v1065_v26 = vmul.f32 0.5, %v1064_v1 }
 0x4e6   : > { %v1096_v11 = vmul.f32 %v2179_v24, %v1087_v22 }
 0x4e7   : > { %v1066_v2 = vsub.f32 1.5, %v1065_v26 }
 0x4e8   : > { %v1105_v0 = vadd.f32 %v2182_v20, %v1096_v11 }
 0x4e9   : > { %v1067_v63 = vmul.f32 %v1547_v51, %v1066_v2 }
 0x4ea   : > { %v1113_v60 = vmax.f32 %v1105_v0, 0.0 }
 0x4eb   : > { %v1071_v15 = vsel %vm1070_vm5, %v1547_v51, %v1067_v63 }
 0x4ec   : > { %1431 = vmatmul.msk.f32.gmra.mxu3 %vm311_vm0, %v1113_v60  ;;  %v1088_v3 = vmul.f32 %v1071_v15, %v2152_v10  ;;  %v1237_v60 = vperm.slane %v2056_v12, 1 }
 0x4ee   : > { %v1097_v59 = vmul.f32 %v2179_v24, %v1088_v3 }
 0x4f0   : > { %v1106_v44 = vadd.f32 %v2182_v20, %v1097_v59 }
 0x4f2   : > { %v1114_v50 = vmax.f32 %v1106_v44, 0.0 }
 0x4f4   : > { %1432 = vmatmul.msk.f32.gmra.mxu3 %vm311_vm0, %v1114_v50 }
 0x528   : > { %v985_v5 = vpop.xlane.xlu1 %984 }
 0x529   : > { %v993_v6 = vmul.f32 %v985_v5, %v1894_v8 }
 0x52b   : > { %v1001_v62 = vadd.f32 1e-05, %v993_v6 }
 0x52d   : > { %1548 = vrsqrt.f32 %v1001_v62  ;;  %vm1078_vm7 = vweird.f32 %v1001_v62 }
 0x533   : > { %v1549_v32 = vpop.eup %1548 }
 0x534   : > { %v1073_v34 = vmul.f32 %v1549_v32, %v1001_v62  ;;  %vm1079_vm6 = vweird.f32 %v1549_v32 }
 0x535   : > { %vm1080_vm8 = vmor %vm1078_vm7, %vm1079_vm6 }
 0x536   : > { %v1074_v16 = vmul.f32 %v1549_v32, %v1073_v34 }
 0x538   : > { %v1075_v46 = vmul.f32 0.5, %v1074_v16 }
 0x53a   : > { %v1076_v17 = vsub.f32 1.5, %v1075_v46 }
 0x53c   : > { %v1077_v61 = vmul.f32 %v1549_v32, %v1076_v17 }
 0x53e   : > { %v1081_v10 = vsel %vm1080_vm8, %v1549_v32, %v1077_v61 }
 0x53f   : > { %v1089_v18 = vmul.f32 %v1081_v10, %v2172_v53 }
 0x541   : > { %v1098_v14 = vmul.f32 %v2179_v24, %v1089_v18 }
 0x543   : > { %v1107_v8 = vadd.f32 %v2182_v20, %v1098_v14  ;;  %v375_v14 = vadd.f32 %v1866_v29, %v2059_v13 }
 0x545   : > { %v1115_v41 = vmax.f32 %v1107_v8, 0.0 }
 0x547   : > { %v1161_v25 = vpop.f32.mrf.mxu3  ;;  %1433 = vmatmul.msk.f32.gmra.mxu3 %vm311_vm0, %v1115_v41  ;;  %vm1247_vm0 = vcmask 1041409   ;;  %v799_v41 = vadd.f32 %v2217_v9, %v375_v14 }
 0x548   : > { %v1185_v21 = vadd.f32 %v1161_v25, %v2065_v37 }
 0x54a   : > { %v1193_v49 = vmax.f32 %v1185_v21, 0.0 }
 0x54c   : > { %v1201_v53 = vsel %vm378_vm1, %v1193_v49, 0.0 }
 0x54f   : > { %v1164_v31 = vpop.f32.mrf.mxu3 }
 0x550   : > { %v1186_v23 = vadd.f32 %v1164_v31, %v793_v35 }
 0x552   : > { %v1194_v27 = vmax.f32 %v1186_v23, 0.0 }
 0x554   : > { %v1202_v24 = vsel %vm378_vm1, %v1194_v27, 0.0 }
 0x555   : > { %v1203_v20 = vadd.f32 %v1202_v24, %v1201_v53 }
 0x557   : > { %v1167_v28 = vpop.f32.mrf.mxu3  ;;  %v1204_v40 = vrot.slane %v1203_v20, 4 }
 0x558   : > { %v1187_v45 = vadd.f32 %v1167_v28, %v2076_v38 }
 0x559   : > { %v1205_v37 = vadd.f32 %v1204_v40, %v1203_v20  ;;  %v1687_v40 = vmov 0  }
 0x55a   : > { %v1195_v47 = vmax.f32 %v1187_v45, 0.0  ;;  %1515 = vset.pattern.permute.xlu0 %v1687_v40 }
 0x55b   : > { %v1206_v4 = vrot.slane %v1205_v37, 2 }
 0x55c   : > { %v1210_v42 = vsel %vm378_vm1, %v1195_v47, 0.0 }
 0x55d   : > { %v1207_v56 = vadd.f32 %v1206_v4, %v1205_v37 }
 0x55f   : > { %v1170_v30 = vpop.f32.mrf.mxu3  ;;  %v1208_v1 = vrot.slane %v1207_v56, 1 }
 0x560   : > { %v1188_v39 = vadd.f32 %v1170_v30, %v2081_v19  ;;  %v1260_v30 = vperm.slane %v2056_v12, 2 }
 0x561   : > { %v1209_v0 = vadd.f32 %v1208_v1, %v1207_v56 }
 0x562   : > { %v1196_v36 = vmax.f32 %v1188_v39, 0.0 }
 0x564   : > { %v1211_v52 = vsel %vm378_vm1, %v1196_v36, 0.0 }
 0x565   : > { %v1212_v51 = vadd.f32 %v1211_v52, %v1210_v42 }
 0x567   : > { %v1213_v54 = vrot.slane %v1212_v51, 4  ;;  %v1173_v55 = vpop.f32.mrf.mxu3 }
 0x568   : > { %v1189_v38 = vadd.f32 %v1173_v55, %v2086_v48  ;;  %v1238_v48 = vmul.f32 %v1237_v60, %v1209_v0 }
 0x569   : > { %v1214_v58 = vadd.f32 %v1213_v54, %v1212_v51 }
 0x56a   : > { %v1197_v19 = vmax.f32 %v1189_v38, 0.0 }
 0x56b   : > { %v1215_v57 = vrot.slane %v1214_v58, 2 }
 0x56c   : > { %v1219_v59 = vsel %vm378_vm1, %v1197_v19, 0.0 }
 0x56d   : > { %v1216_v22 = vadd.f32 %v1215_v57, %v1214_v58 }
 0x56f   : > { %v1217_v26 = vrot.slane %v1216_v22, 1  ;;  %v1176_v11 = vpop.f32.mrf.mxu3 }
 0x570   : > { %v1190_v2 = vadd.f32 %v1176_v11, %v2091_v33 }
 0x571   : > { %v1218_v63 = vadd.f32 %v1217_v26, %v1216_v22 }
 0x572   : > { %v1198_v15 = vmax.f32 %v1190_v2, 0.0 }
 0x573   : > { %v1239_v3 = vmul.f32 %v1237_v60, %v1218_v63 }
 0x574   : > { %v1220_v44 = vsel %vm378_vm1, %v1198_v15, 0.0 }
 0x575   : > { %v1221_v50 = vadd.f32 %v1220_v44, %v1219_v59  ;;  %v1246_v5 = vrot.slane %v1239_v3, 7 }
 0x577   : > { %v1222_v6 = vrot.slane %v1221_v50, 4  ;;  %v1248_v62 = vsel %vm1247_vm0, %v1246_v5, %v1238_v48  ;;  %v1179_v18 = vpop.f32.mrf.mxu3 }
 0x578   : > { %v1191_v8 = vadd.f32 %v1179_v18, %v2096_v43 }
 0x579   : > { %v1223_v32 = vadd.f32 %v1222_v6, %v1221_v50 }
 0x57a   : > { %v1199_v7 = vmax.f32 %v1191_v8, 0.0 }
 0x57b   : > { %v1224_v34 = vrot.slane %v1223_v32, 2 }
 0x57c   : > { %v1228_v31 = vsel %vm378_vm1, %v1199_v7, 0.0 }
 0x57d   : > { %v1225_v16 = vadd.f32 %v1224_v34, %v1223_v32 }
 0x57f   : > { %v1226_v33 = vrot.slane %v1225_v16, 1 }
 0x581   : > { %v1227_v46 = vadd.f32 %v1226_v33, %v1225_v16 }
 0x583   : > { %v1240_v17 = vmul.f32 %v1237_v60, %v1227_v46 }
 0x585   : > { %v1249_v61 = vrot.slane %v1240_v17, 6 }
 0x587   : > { %v1251_v10 = vsel %vm1250_vm9, %v1249_v61, %v1248_v62 }
 0x5ca   : > { %v1182_v25 = vpop.f32.mrf.mxu3 }
 0x5cb   : > { %v1192_v21 = vadd.f32 %v1182_v25, %v799_v41 }
 0x5cd   : > { %v1200_v35 = vmax.f32 %v1192_v21, 0.0 }
 0x5cf   : > { %v1229_v49 = vsel %vm378_vm1, %v1200_v35, 0.0 }
 0x5d0   : > { %v1230_v23 = vadd.f32 %v1229_v49, %v1228_v31 }
 0x5d2   : > { %v1231_v27 = vrot.slane %v1230_v23, 4 }
 0x5d4   : > { %v1232_v53 = vadd.f32 %v1231_v27, %v1230_v23 }
 0x5d6   : > { %v1233_v24 = vrot.slane %v1232_v53, 2 }
 0x5d8   : > { %v1234_v20 = vadd.f32 %v1233_v24, %v1232_v53 }
 0x5da   : > { %v1235_v28 = vrot.slane %v1234_v20, 1 }
 0x5dc   : > { %v1236_v29 = vadd.f32 %v1235_v28, %v1234_v20 }
 0x5de   : > { %v1241_v13 = vmul.f32 %v1237_v60, %v1236_v29 }
 0x5e0   : > { %v1252_v43 = vrot.slane %v1241_v13, 5 }
 0x5e2   : > { %v1254_v9 = vsel %vm1253_vm10, %v1252_v43, %v1251_v10 }
 0x5e3   : > { %v1257_v45 = vsel %vm1256_vm11, %v1254_v9, 0.0 }
 0x5e4   : > { %1258 = vadd.xlane.f32.xlu2 %v1257_v45 }
 0x657   : > { %v1259_v47 = vpop.xlane.xlu2 %1258 }
 0x658   : > { %v1261_v39 = vadd.f32 %v1260_v30, %v1259_v47 }
 0x65a   : > { %1264 = vperm.xlu0 %1515, %v1261_v39  }
 0x6cc   : > { %v1265_v37 = vpop.permute.xlu0 %1264 }
 0x6cd   : > { %1267 = vst [vmem:[%s281_s17] sm:$0xf] %v1265_v37 }
 0x6ce   : > { %1637 = shalt.err (!%p1634_p8)
}
 0x6cf   : > { %1459 = dma.vmem_to_hbm [thread:$0]  (%p1761_p5), %s1282_s18, 64, %s1284_s19, %s1269_s20  }
 0x6d0 PF: > { %p1476_p9 = scmp.ge.s32.totalorder %s1680_s24, 2  ;;  %s1295_s13 = sand.u32 1, %s1668_s21  }
 0x6d1   : > { %s1296_s14 = scalar_lea.sflag [#allocation4], %s1295_s13 }
 0x6d2   : > { %p1469_p10 = pnand %p1476_p9, %p1765_p6 }
 0x6d4   : > { %p1470_p11 = pneg %p1469_p10 }
 0x6d6   : > { %1663 = dma.done.wait (%p1470_p11), %s1296_s14, 64  }
 0x6d7   : > { %1665 = vsyncadd (%p1470_p11), %s1296_s14, 4294967232  ;;  %p18_p12 = scmp.ge.s32.totalorder %s1748_s27, 4   ;;  %s2291_s21 = smov %s1672_s22 }
 0x6d8   : > { %s2292_s22 = smov %s1676_s23  ;;  %s2293_s23 = smov %s1759_s30 }
 0x6d9   : > { %s2294_s24 = smov %s1748_s27  ;;  %20 = sbr.rel (!%p18_p12) target bundleno = 5 (0x5), region = 90 }
 0x6de   :  { %1302 = vsyncpa [#allocation3], 1 }
 0x6df   :  { %1304 = vsyncpa [#allocation3 + $0x1], 1 }
 0x6e0   :  { %1305 = vsyncpa [#allocation6], 1 }
 0x6e1   :  { %1306 = vsyncpa [#allocation4], 1 }
 0x6e2   :  { %1308 = vsyncpa [#allocation4 + $0x1], 1 }

</bundles_post_ra>
